<compile_context>
chip_gen: v6e
topology: v6e:2x2x1
jax: 0.10.0
libtpu: 0.0.40
codegen_flags: <defaults>
</compile_context>

<pallas_src>
import random

import numpy as np
import jax
import jax.numpy as jnp
from jax.experimental import pallas as pl
from jax.experimental.pallas import tpu as pltpu


# ----------------------------- Pallas kernel ------------------------------- #

def _texture_render_kernel(x_ref, matT_ref, o_ref):
    """One M-panel of Y = X @ MatT; full K resident, single MXU matmul, no scratch."""
    o_ref[...] = jnp.dot(
        x_ref[...], matT_ref[...], preferred_element_type=jnp.float32
    ).astype(o_ref.dtype)


def texture_render_matmul(x_flat, matT, *, tn=None,
                          vmem_budget_bytes=32 * 1024 * 1024):
    """Y[B, M] = x_flat[B, K] @ matT[K, M]  (== (mat @ x_flat^T)^T).

    The whole K axis stays resident (no reduction grid axis / accumulator).
    M is split into lane-dense panels only if matT would blow the VMEM budget;
    at the module's default sizes it is a single grid step.
    """
    B, K = x_flat.shape
    K2, M = matT.shape
    assert K == K2

    # Pad batch to a multiple of 8: full f32 sublane occupancy for LHS and output
    # vregs (avoids masked partial stores).  Padding rows are zero; slice after.
    B_pad = ((B + 7) // 8) * 8
    if B_pad != B:
        x_flat = jnp.concatenate(
            [x_flat, jnp.zeros((B_pad - B, K), dtype=x_flat.dtype)], axis=0
        )

    itemsize = jnp.dtype(x_flat.dtype).itemsize

    if tn is None:
        # Double-buffered matT panel + resident x + output panel must fit the budget.
        def fits(t):
            return 2 * (K * t + B_pad * K + B_pad * t) * itemsize <= vmem_budget_bytes

        if fits(M):
            tn = M                      # single grid step (the common case here)
        else:
            tn = 128
            while tn * 2 <= M and M % (tn * 2) == 0 and fits(tn * 2):
                tn *= 2
    assert M % tn == 0, "M must be divisible by the chosen panel width tn"

    grid = (M // tn,)
    y = pl.pallas_call(
        _texture_render_kernel,
        out_shape=jax.ShapeDtypeStruct((B_pad, M), x_flat.dtype),
        grid_spec=pltpu.PrefetchScalarGridSpec(
            num_scalar_prefetch=0,
            grid=grid,
            in_specs=[
                # x: full (B_pad, K) block, constant index_map -> fetched once, resident.
                pl.BlockSpec((B_pad, K), lambda j: (0, 0)),
                # matT: one (K, tn) M-panel per grid step.
                pl.BlockSpec((K, tn), lambda j: (0, j)),
            ],
            out_specs=pl.BlockSpec((B_pad, tn), lambda j: (0, j)),
        ),
        compiler_params=pltpu.CompilerParams(
            dimension_semantics=("parallel",),
        ),
    )(x_flat, matT)
    return y[:B]


# --------------------------- Module-level wrapper --------------------------- #

class TextureToImagePallas:
    """JAX/Pallas port of TextureToImage with synthetic, deterministic params."""

    def __init__(self, batch_size, img_size=16, tex_size=16, channels=3,
                 bbox_size=(8, 4), center_random_margin=2, isRandom=True, seed=0):
        self.batch_size = batch_size
        self.img_size = img_size
        self.tex_size = tex_size
        self.channels = channels
        self.bbox_size = bbox_size
        self.center_random_margin = center_random_margin
        self.isRandom = isRandom

        random.seed(seed)

        K = tex_size * tex_size * channels        # flattened texture dim
        M = img_size * img_size * channels        # flattened rendered image dim

        # Deterministic synthetic "render sparse matrix" (stored dense here).
        # TODO(synk): original module loads a scipy sparse matrix from an .npz;
        # a dense stand-in is used since no data files may be read.
        key = jax.random.PRNGKey(seed)
        k_mat, k_mask = jax.random.split(key)
        mat = jax.random.normal(k_mat, (M, K), dtype=jnp.float32)
        keep = jax.random.uniform(k_mask, (M, K)) < 0.05    # sparse-ish like a renderer
        mat = jnp.where(keep, mat, 0.0).astype(jnp.float32)

        # Synthetic mask (img, img, 3): a rectangle of ones (like a rendered-person mask).
        mask_np = np.zeros((img_size, img_size, 3), dtype=np.float32)
        mask_np[img_size // 4: 3 * img_size // 4,
                img_size // 4: 3 * img_size // 4, :] = 1.0

        bbox = self._bbox(mask_np[:, :, 0])

        # mask: (1, img, img, 3) -> (1, 3, img, img) -> repeat over batch
        mask = jnp.asarray(mask_np)[None].transpose(0, 3, 1, 2)
        mask = jnp.tile(mask, (batch_size, 1, 1, 1))

        self.action_sparse_tensor_data = [
            {"mat": mat, "matT": jnp.asarray(mat).T, "mask": mask, "bbox": bbox}
        ]

    def _bbox(self, img):
        h, w = self.bbox_size
        rows = np.any(img, axis=0)
        cols = np.any(img, axis=1)
        cmin, cmax = np.where(rows)[0][[0, -1]]
        rmin, rmax = np.where(cols)[0][[0, -1]]
        r_center = float(rmax + rmin) / 2 + random.randint(-self.center_random_margin, 0)
        c_center = float(cmax + cmin) / 2 + random.randint(0, self.center_random_margin)
        rmin = int(r_center - h / 2)
        rmax = int(r_center + h / 2)
        cmin = int(c_center - w / 2)
        cmax = int(c_center + w / 2)
        return ((cmin, rmin), (cmax, rmax))

    def __call__(self, x):
        # x: (B, C, H, W)  (NCHW, like the PyTorch module)
        B = self.batch_size
        assert x.shape[0] == B

        # NCHW -> NHWC -> (B, H*W*C)   (same flatten order as torch reshape)
        x_nhwc = jnp.transpose(x, (0, 2, 3, 1))
        x_flat = x_nhwc.reshape(B, -1)

        action = (random.choice(self.action_sparse_tensor_data)
                  if self.isRandom else self.action_sparse_tensor_data[0])
        matT = action["matT"]
        mask = action["mask"]
        bbox = action["bbox"]

        # Hot path: dense "sparse render" matmul in Pallas.
        y = texture_render_matmul(x_flat, matT)          # (B, M) == (mat @ x_flat^T)^T

        result = y.reshape(B, self.img_size, self.img_size, -1)   # (B, img, img, C)
        result = jnp.transpose(result, (0, 3, 1, 2))               # NCHW
        return result, mask, bbox


# ------------------------------------ main ---------------------------------- #

if __name__ == "__main__":
    B, C, TEX, IMG = 2, 3, 16, 16

    module = TextureToImagePallas(batch_size=B, img_size=IMG, tex_size=TEX,
                                  channels=C, bbox_size=(8, 4),
                                  center_random_margin=2, isRandom=True, seed=0)

    key = jax.random.PRNGKey(0)
    x = jax.random.normal(key, (B, C, TEX, TEX), dtype=jnp.float32)

    result, mask, bbox = module(x)
    result = jax.block_until_ready(result)
    mask = jax.block_until_ready(mask)

    # Cross-check against plain-JAX reference of the same math.
    mat = module.action_sparse_tensor_data[0]["mat"]
    x_flat_T = jnp.transpose(x, (0, 2, 3, 1)).reshape(B, -1).T        # (K, B)
    ref_flat = (mat @ x_flat_T).T                                     # (B, M)
    ref = jnp.transpose(ref_flat.reshape(B, IMG, IMG, -1), (0, 3, 1, 2))
    np.testing.assert_allclose(np.asarray(result), np.asarray(ref),
                               rtol=1e-5, atol=1e-5)

    assert result.shape == (B, C, IMG, IMG)
    assert mask.shape == (B, 3, IMG, IMG)
    assert isinstance(bbox, tuple) and len(bbox) == 2

    print("KERNEL_OK")
</pallas_src>

<mosaic_0001>
module attributes {stable_mosaic.version = 11 : i64} {
  func.func @_texture_render_kernel(%arg0: i32, %arg1: memref<8x768xf32, #tpu.memory_space<vmem>>, %arg2: memref<768x768xf32, #tpu.memory_space<vmem>>, %arg3: memref<8x768xf32, #tpu.memory_space<vmem>>) attributes {dimension_semantics = [#tpu.dimension_semantics<parallel>], iteration_bounds = array<i64: 1>, scalar_prefetch = 0 : i64, scratch_operands = 0 : i64, tpu.core_type = #tpu.core_type<tc>, window_params = [{pipeline_mode = #tpu.pipeline_mode<synchronous>, transform_indices = @transform_0, window_bounds = array<i64: 8, 768>}, {transform_indices = @transform_1, window_bounds = array<i64: 768, 768>}, {transform_indices = @transform_2, window_bounds = array<i64: 8, 768>}]} {
    %c0 = arith.constant 0 : index
    %c0_0 = arith.constant 0 : index
    %0 = vector.load %arg1[%c0, %c0_0] : memref<8x768xf32, #tpu.memory_space<vmem>>, vector<8x768xf32>
    %c0_1 = arith.constant 0 : index
    %c0_2 = arith.constant 0 : index
    %1 = vector.load %arg2[%c0_1, %c0_2] : memref<768x768xf32, #tpu.memory_space<vmem>>, vector<768x768xf32>
    %cst = arith.constant dense<0.000000e+00> : vector<8x768xf32>
    %2 = tpu.matmul %0, %1, %cst {dimension_numbers = #tpu.dot_dimension_numbers<[1], [0], [0], [1], [0, 0, 1, 1], [], []>} : vector<8x768xf32>, vector<768x768xf32>, vector<8x768xf32> -> vector<8x768xf32>
    %c0_3 = arith.constant 0 : index
    %c0_4 = arith.constant 0 : index
    %3 = vector.load %arg3[%c0_3, %c0_4] : memref<8x768xf32, #tpu.memory_space<vmem>>, vector<8x768xf32>
    tpu.vector_store %arg3[%c0_3, %c0_4], %2 {strides = array<i32>} : memref<8x768xf32, #tpu.memory_space<vmem>>, vector<8x768xf32>,
    return
  }
  func.func @transform_0(%arg0: i32) -> (i32, i32) {
    %c0_i32 = arith.constant 0 : i32
    %c0_i32_0 = arith.constant 0 : i32
    %c0_i32_1 = arith.constant 0 : i32
    return %c0_i32, %c0_i32_0 : i32, i32
  }
  func.func @transform_1(%arg0: i32) -> (i32, i32) {
    %c0_i32 = arith.constant 0 : i32
    %c0_i32_0 = arith.constant 0 : i32
    return %c0_i32, %arg0 : i32, i32
  }
  func.func @transform_2(%arg0: i32) -> (i32, i32) {
    %c0_i32 = arith.constant 0 : i32
    %c0_i32_0 = arith.constant 0 : i32
    return %c0_i32, %arg0 : i32, i32
  }
}

</mosaic_0001>

<bundles_post_ra>
// kernel: tpu_custom_call.1
= control target key start
LH: loop header
LB: loop body
LE: loop exit
PB: predicated region body
PF: predicated region fallthrough
CT: control target
= control target key end

     0   :  { %7 = vsyncpa [#allocation3], 0  ;;  %s1411_s0 = inlined_call_operand.hbm [shape: f32[8,768], index: 0, kind: input, shape index: {}]   ;;  %s1412_s1 = inlined_call_operand.hbm [shape: f32[768,768], index: 1, kind: input, shape index: {}]   ;;  %s1413_s2 = inlined_call_operand.hbm [shape: f32[8,768], index: 2, kind: output, shape index: {}]  }
   0x1   :  { %8 = vsyncpa [#allocation6], 0 }
   0x2   :  { %9 = vsyncpa [#allocation4], 0  ;;  %s1358_s9 = smov [#allocation2]   ;;  %s1359_s11 = smov [#allocation5]  }
   0x3   :  { %s16_s10 = sshll.u32 %s1358_s9, 4  ;;  %s25_s12 = sshll.u32 %s1359_s11, 4  ;;  %s17_s10 = int_to_ptr.vmem [resolvable:$true] %s16_s10  ;;  %s26_s12 = int_to_ptr.vmem [resolvable:$true] %s25_s12 }
   0x4   :  { %s1300_s13 = scalar_lea.vmem %s17_s10, 768  ;;  %p1305_p1 = scmp.lt.s32.totalorder %s17_s10, %s17_s10 }
   0x5   :  { %p1301_p0 = scmp.ne.s32.totalorder %s17_s10, %s1300_s13  ;;  %p1306_p2 = scmp.lt.s32.totalorder %s1300_s13, %s1300_s13 }
   0x7   :  { %p1307_p3 = por %p1306_p2, %p1305_p1 }
   0x9   :  { %p1308_p4 = pnand %p1307_p3, %p1301_p0 }
   0xb   :  { %1311 = shalt.err (!%p1308_p4)
}
   0xc   :  { %19 = dma.hbm_to_vmem [thread:$0]  %s1411_s0, 768, %s17_s10, [#allocation3]  }
   0xd   :  { %s1320_s16 = scalar_lea.vmem %s26_s12, 73728  ;;  %p1325_p6 = scmp.lt.s32.totalorder %s26_s12, %s26_s12 }
   0xe   :  { %p1321_p5 = scmp.ne.s32.totalorder %s26_s12, %s1320_s16  ;;  %p1326_p7 = scmp.lt.s32.totalorder %s1320_s16, %s1320_s16 }
  0x10   :  { %p1327_p8 = por %p1326_p7, %p1325_p6 }
  0x12   :  { %p1328_p9 = pnand %p1327_p8, %p1321_p5 }
  0x14   :  { %1331 = shalt.err (!%p1328_p9)
}
  0x15   :  { %s1360_s17 = smov 768   ;;  %s1361_s18 = smov 48  }
  0x16   :  { %31 = dma.hbm_to_vmem [thread:$0]  %s1412_s1, 73728, %s26_s12, [#allocation6], %s1360_s17, %s1360_s17, %s1361_s18  }
  0x17   :  { %1352 = dma.done.wait [#allocation3], 768  }
  0x18   :  { %1353 = vsyncadd [#allocation3], 4294966528 }
  0x19   :  { %1354 = dma.done.wait [#allocation6], 73728  }
  0x1a   :  { %1355 = vsyncadd [#allocation6], 4294893568  ;;  %v135_v0 = vld [vmem:[#allocation5 + $0x2d8] sm:$0xff]  ;;  %v134_v2 = vld [vmem:[#allocation5 + $0x2d0] sm:$0xff]  ;;  %s1362_s0 = smov [#allocation7]  }
  0x1b   :  { %v327_v1 = vld [vmem:[#allocation5 + $0x8d8] sm:$0xff]  ;;  %620 = vmatprep.subr.mxu0 %v135_v0  ;;  %v326_v3 = vld [vmem:[#allocation5 + $0x8d0] sm:$0xff]  ;;  %v129_v4 = vld [vmem:[#allocation5 + $0x2a8] sm:$0xff]  ;;  %s1271_s1 = sshll.u32 %s1362_s0, 4  ;;  %s1272_s1 = int_to_ptr.vmem [resolvable:$true] %s1271_s1 }
  0x1c   :  { %691 = vmatprep.subr.mxu1 %v327_v1  ;;  %v321_v5 = vld [vmem:[#allocation5 + $0x8a8] sm:$0xff]  ;;  %621 = vmatpush1.msra.mxu0 %v134_v2  ;;  %v128_v6 = vld [vmem:[#allocation5 + $0x2a0] sm:$0xff]  ;;  %v123_v8 = vld [vmem:[#allocation5 + $0x278] sm:$0xff]  ;;  %s1332_s21 = scalar_lea.vmem %s1272_s1, 768  ;;  %p1337_p11 = scmp.lt.s32.totalorder %s1272_s1, %s1272_s1 }
  0x1d   :  { %692 = vmatpush1.msra.mxu1 %v326_v3  ;;  %v320_v7 = vld [vmem:[#allocation5 + $0x8a0] sm:$0xff]  ;;  %622 = vmatprep.subr.mxu0 %v129_v4  ;;  %v315_v9 = vld [vmem:[#allocation5 + $0x878] sm:$0xff]  ;;  %v122_v10 = vld [vmem:[#allocation5 + $0x270] sm:$0xff]  ;;  %p1333_p10 = scmp.ne.s32.totalorder %s1272_s1, %s1332_s21  ;;  %p1338_p12 = scmp.lt.s32.totalorder %s1332_s21, %s1332_s21 }
  0x1e   :  { %693 = vmatprep.subr.mxu1 %v321_v5  ;;  %v314_v11 = vld [vmem:[#allocation5 + $0x870] sm:$0xff]  ;;  %623 = vmatpush1.msra.mxu0 %v128_v6  ;;  %v117_v12 = vld [vmem:[#allocation5 + $0x248] sm:$0xff]  ;;  %v116_v14 = vld [vmem:[#allocation5 + $0x240] sm:$0xff] }
  0x1f   :  { %694 = vmatpush1.msra.mxu1 %v320_v7  ;;  %v309_v13 = vld [vmem:[#allocation5 + $0x848] sm:$0xff]  ;;  %624 = vmatprep.subr.mxu0 %v123_v8  ;;  %v308_v15 = vld [vmem:[#allocation5 + $0x840] sm:$0xff]  ;;  %v111_v16 = vld [vmem:[#allocation5 + $0x218] sm:$0xff]  ;;  %p1339_p13 = por %p1338_p12, %p1337_p11 }
  0x20   :  { %695 = vmatprep.subr.mxu1 %v315_v9  ;;  %625 = vmatpush1.msra.mxu0 %v122_v10  ;;  %v303_v17 = vld [vmem:[#allocation5 + $0x818] sm:$0xff]  ;;  %v110_v18 = vld [vmem:[#allocation5 + $0x210] sm:$0xff]  ;;  %v105_v20 = vld [vmem:[#allocation5 + $0x1e8] sm:$0xff] }
  0x21   :  { %696 = vmatpush1.msra.mxu1 %v314_v11  ;;  %626 = vmatprep.subr.mxu0 %v117_v12  ;;  %v302_v19 = vld [vmem:[#allocation5 + $0x810] sm:$0xff]  ;;  %v297_v21 = vld [vmem:[#allocation5 + $0x7e8] sm:$0xff]  ;;  %v104_v22 = vld [vmem:[#allocation5 + $0x1e0] sm:$0xff]  ;;  %p1340_p0 = pnand %p1339_p13, %p1333_p10 }
  0x22   :  { %697 = vmatprep.subr.mxu1 %v309_v13  ;;  %627 = vmatpush1.msra.mxu0 %v116_v14  ;;  %v296_v23 = vld [vmem:[#allocation5 + $0x7e0] sm:$0xff]  ;;  %v99_v24 = vld [vmem:[#allocation5 + $0x1b8] sm:$0xff]  ;;  %v98_v26 = vld [vmem:[#allocation5 + $0x1b0] sm:$0xff] }
  0x23   :  { %698 = vmatpush1.msra.mxu1 %v308_v15  ;;  %628 = vmatprep.subr.mxu0 %v111_v16  ;;  %v291_v25 = vld [vmem:[#allocation5 + $0x7b8] sm:$0xff]  ;;  %v290_v27 = vld [vmem:[#allocation5 + $0x7b0] sm:$0xff]  ;;  %v93_v28 = vld [vmem:[#allocation5 + $0x188] sm:$0xff] }
  0x24   :  { %699 = vmatprep.subr.mxu1 %v303_v17  ;;  %629 = vmatpush1.msra.mxu0 %v110_v18  ;;  %v285_v29 = vld [vmem:[#allocation5 + $0x788] sm:$0xff]  ;;  %v92_v30 = vld [vmem:[#allocation5 + $0x180] sm:$0xff]  ;;  %v87_v32 = vld [vmem:[#allocation5 + $0x158] sm:$0xff] }
  0x25   :  { %700 = vmatpush1.msra.mxu1 %v302_v19  ;;  %630 = vmatprep.subr.mxu0 %v105_v20  ;;  %v284_v31 = vld [vmem:[#allocation5 + $0x780] sm:$0xff]  ;;  %v279_v33 = vld [vmem:[#allocation5 + $0x758] sm:$0xff]  ;;  %v86_v34 = vld [vmem:[#allocation5 + $0x150] sm:$0xff] }
  0x26   :  { %701 = vmatprep.subr.mxu1 %v297_v21  ;;  %631 = vmatpush1.msra.mxu0 %v104_v22  ;;  %v278_v35 = vld [vmem:[#allocation5 + $0x750] sm:$0xff]  ;;  %v81_v36 = vld [vmem:[#allocation5 + $0x128] sm:$0xff]  ;;  %v80_v38 = vld [vmem:[#allocation5 + $0x120] sm:$0xff] }
  0x27   :  { %702 = vmatpush1.msra.mxu1 %v296_v23  ;;  %632 = vmatprep.subr.mxu0 %v99_v24  ;;  %v273_v37 = vld [vmem:[#allocation5 + $0x728] sm:$0xff]  ;;  %v272_v39 = vld [vmem:[#allocation5 + $0x720] sm:$0xff]  ;;  %v75_v40 = vld [vmem:[#allocation5 + $0xf8] sm:$0xff] }
  0x28   :  { %703 = vmatprep.subr.mxu1 %v291_v25  ;;  %633 = vmatpush1.msra.mxu0 %v98_v26  ;;  %v267_v41 = vld [vmem:[#allocation5 + $0x6f8] sm:$0xff]  ;;  %v74_v42 = vld [vmem:[#allocation5 + $0xf0] sm:$0xff]  ;;  %v69_v44 = vld [vmem:[#allocation5 + $0xc8] sm:$0xff] }
  0x29   :  { %704 = vmatpush1.msra.mxu1 %v290_v27  ;;  %634 = vmatprep.subr.mxu0 %v93_v28  ;;  %v266_v43 = vld [vmem:[#allocation5 + $0x6f0] sm:$0xff]  ;;  %v261_v45 = vld [vmem:[#allocation5 + $0x6c8] sm:$0xff]  ;;  %v68_v46 = vld [vmem:[#allocation5 + $0xc0] sm:$0xff] }
  0x2a   :  { %705 = vmatprep.subr.mxu1 %v285_v29  ;;  %635 = vmatpush1.msra.mxu0 %v92_v30  ;;  %v260_v47 = vld [vmem:[#allocation5 + $0x6c0] sm:$0xff]  ;;  %v63_v48 = vld [vmem:[#allocation5 + $0x98] sm:$0xff]  ;;  %v62_v50 = vld [vmem:[#allocation5 + $0x90] sm:$0xff] }
  0x2b   :  { %706 = vmatpush1.msra.mxu1 %v284_v31  ;;  %636 = vmatprep.subr.mxu0 %v87_v32  ;;  %v255_v49 = vld [vmem:[#allocation5 + $0x698] sm:$0xff]  ;;  %v254_v51 = vld [vmem:[#allocation5 + $0x690] sm:$0xff]  ;;  %v57_v52 = vld [vmem:[#allocation5 + $0x68] sm:$0xff] }
  0x2c   :  { %707 = vmatprep.subr.mxu1 %v279_v33  ;;  %637 = vmatpush1.msra.mxu0 %v86_v34  ;;  %v249_v53 = vld [vmem:[#allocation5 + $0x668] sm:$0xff]  ;;  %v56_v54 = vld [vmem:[#allocation5 + $0x60] sm:$0xff]  ;;  %v51_v56 = vld [vmem:[#allocation5 + $0x38] sm:$0xff] }
  0x2d   :  { %708 = vmatpush1.msra.mxu1 %v278_v35  ;;  %638 = vmatprep.subr.mxu0 %v81_v36  ;;  %v248_v55 = vld [vmem:[#allocation5 + $0x660] sm:$0xff]  ;;  %v243_v57 = vld [vmem:[#allocation5 + $0x638] sm:$0xff]  ;;  %v50_v58 = vld [vmem:[#allocation5 + $0x30] sm:$0xff] }
  0x2e   :  { %709 = vmatprep.subr.mxu1 %v273_v37  ;;  %639 = vmatpush1.msra.mxu0 %v80_v38  ;;  %v242_v59 = vld [vmem:[#allocation5 + $0x630] sm:$0xff]  ;;  %v45_v60 = vld [vmem:[#allocation5 + $0x8] sm:$0xff]  ;;  %v44_v62 = vld [vmem:[#allocation5] sm:$0xff] }
  0x2f   :  { %710 = vmatpush1.msra.mxu1 %v272_v39  ;;  %640 = vmatprep.subr.mxu0 %v75_v40  ;;  %v237_v61 = vld [vmem:[#allocation5 + $0x608] sm:$0xff]  ;;  %v236_v63 = vld [vmem:[#allocation5 + $0x600] sm:$0xff]  ;;  %v231_v0 = vld [vmem:[#allocation5 + $0x5d8] sm:$0xff] }
  0x30   :  { %711 = vmatprep.subr.mxu1 %v267_v41  ;;  %641 = vmatpush1.msra.mxu0 %v74_v42  ;;  %v423_v1 = vld [vmem:[#allocation5 + $0xbd8] sm:$0xff]  ;;  %v230_v2 = vld [vmem:[#allocation5 + $0x5d0] sm:$0xff]  ;;  %v225_v4 = vld [vmem:[#allocation5 + $0x5a8] sm:$0xff] }
  0x31   :  { %712 = vmatpush1.msra.mxu1 %v266_v43  ;;  %642 = vmatprep.subr.mxu0 %v69_v44  ;;  %v422_v3 = vld [vmem:[#allocation5 + $0xbd0] sm:$0xff]  ;;  %v417_v5 = vld [vmem:[#allocation5 + $0xba8] sm:$0xff]  ;;  %v224_v6 = vld [vmem:[#allocation5 + $0x5a0] sm:$0xff] }
  0x32   :  { %713 = vmatprep.subr.mxu1 %v261_v45  ;;  %643 = vmatpush1.msra.mxu0 %v68_v46  ;;  %v416_v7 = vld [vmem:[#allocation5 + $0xba0] sm:$0xff]  ;;  %v219_v8 = vld [vmem:[#allocation5 + $0x578] sm:$0xff]  ;;  %v218_v10 = vld [vmem:[#allocation5 + $0x570] sm:$0xff] }
  0x33   :  { %714 = vmatpush1.msra.mxu1 %v260_v47  ;;  %644 = vmatprep.subr.mxu0 %v63_v48  ;;  %v411_v9 = vld [vmem:[#allocation5 + $0xb78] sm:$0xff]  ;;  %v410_v11 = vld [vmem:[#allocation5 + $0xb70] sm:$0xff]  ;;  %v213_v12 = vld [vmem:[#allocation5 + $0x548] sm:$0xff] }
  0x34   :  { %715 = vmatprep.subr.mxu1 %v255_v49  ;;  %645 = vmatpush1.msra.mxu0 %v62_v50  ;;  %v405_v13 = vld [vmem:[#allocation5 + $0xb48] sm:$0xff]  ;;  %v212_v14 = vld [vmem:[#allocation5 + $0x540] sm:$0xff]  ;;  %v207_v16 = vld [vmem:[#allocation5 + $0x518] sm:$0xff] }
  0x35   :  { %716 = vmatpush1.msra.mxu1 %v254_v51  ;;  %646 = vmatprep.subr.mxu0 %v57_v52  ;;  %v404_v15 = vld [vmem:[#allocation5 + $0xb40] sm:$0xff]  ;;  %v399_v17 = vld [vmem:[#allocation5 + $0xb18] sm:$0xff]  ;;  %v206_v18 = vld [vmem:[#allocation5 + $0x510] sm:$0xff] }
  0x36   :  { %717 = vmatprep.subr.mxu1 %v249_v53  ;;  %647 = vmatpush1.msra.mxu0 %v56_v54  ;;  %v398_v19 = vld [vmem:[#allocation5 + $0xb10] sm:$0xff]  ;;  %v201_v20 = vld [vmem:[#allocation5 + $0x4e8] sm:$0xff]  ;;  %v200_v22 = vld [vmem:[#allocation5 + $0x4e0] sm:$0xff] }
  0x37   :  { %718 = vmatpush1.msra.mxu1 %v248_v55  ;;  %648 = vmatprep.subr.mxu0 %v51_v56  ;;  %v393_v21 = vld [vmem:[#allocation5 + $0xae8] sm:$0xff]  ;;  %v392_v23 = vld [vmem:[#allocation5 + $0xae0] sm:$0xff]  ;;  %v195_v24 = vld [vmem:[#allocation5 + $0x4b8] sm:$0xff] }
  0x38   :  { %719 = vmatprep.subr.mxu1 %v243_v57  ;;  %649 = vmatpush1.msra.mxu0 %v50_v58  ;;  %v387_v25 = vld [vmem:[#allocation5 + $0xab8] sm:$0xff]  ;;  %v194_v26 = vld [vmem:[#allocation5 + $0x4b0] sm:$0xff]  ;;  %v189_v28 = vld [vmem:[#allocation5 + $0x488] sm:$0xff] }
  0x39   :  { %720 = vmatpush1.msra.mxu1 %v242_v59  ;;  %650 = vmatprep.subr.mxu0 %v45_v60  ;;  %v386_v27 = vld [vmem:[#allocation5 + $0xab0] sm:$0xff]  ;;  %v381_v29 = vld [vmem:[#allocation5 + $0xa88] sm:$0xff]  ;;  %v188_v30 = vld [vmem:[#allocation5 + $0x480] sm:$0xff] }
  0x3a   :  { %721 = vmatprep.subr.mxu1 %v237_v61  ;;  %651 = vmatpush1.msra.mxu0 %v44_v62  ;;  %v380_v31 = vld [vmem:[#allocation5 + $0xa80] sm:$0xff]  ;;  %v183_v32 = vld [vmem:[#allocation5 + $0x458] sm:$0xff]  ;;  %v182_v34 = vld [vmem:[#allocation5 + $0x450] sm:$0xff] }
  0x3b   :  { %722 = vmatpush1.msra.mxu1 %v236_v63  ;;  %652 = vmatprep.subr.mxu0 %v231_v0  ;;  %v375_v33 = vld [vmem:[#allocation5 + $0xa58] sm:$0xff]  ;;  %v374_v35 = vld [vmem:[#allocation5 + $0xa50] sm:$0xff]  ;;  %v177_v36 = vld [vmem:[#allocation5 + $0x428] sm:$0xff] }
  0x3c   :  { %723 = vmatprep.subr.mxu1 %v423_v1  ;;  %653 = vmatpush2.msra.mxu0 %v230_v2  ;;  %v369_v37 = vld [vmem:[#allocation5 + $0xa28] sm:$0xff]  ;;  %v176_v38 = vld [vmem:[#allocation5 + $0x420] sm:$0xff]  ;;  %v171_v40 = vld [vmem:[#allocation5 + $0x3f8] sm:$0xff] }
  0x3d   :  { %724 = vmatpush2.msra.mxu1 %v422_v3  ;;  %654 = vmatprep.subr.mxu0 %v225_v4  ;;  %v368_v39 = vld [vmem:[#allocation5 + $0xa20] sm:$0xff]  ;;  %v363_v41 = vld [vmem:[#allocation5 + $0x9f8] sm:$0xff]  ;;  %v170_v42 = vld [vmem:[#allocation5 + $0x3f0] sm:$0xff] }
  0x3e   :  { %725 = vmatprep.subr.mxu1 %v417_v5  ;;  %655 = vmatpush2.msra.mxu0 %v224_v6  ;;  %v362_v43 = vld [vmem:[#allocation5 + $0x9f0] sm:$0xff]  ;;  %v165_v44 = vld [vmem:[#allocation5 + $0x3c8] sm:$0xff]  ;;  %v164_v46 = vld [vmem:[#allocation5 + $0x3c0] sm:$0xff] }
  0x3f   :  { %726 = vmatpush2.msra.mxu1 %v416_v7  ;;  %656 = vmatprep.subr.mxu0 %v219_v8  ;;  %v357_v45 = vld [vmem:[#allocation5 + $0x9c8] sm:$0xff]  ;;  %v356_v47 = vld [vmem:[#allocation5 + $0x9c0] sm:$0xff]  ;;  %v159_v48 = vld [vmem:[#allocation5 + $0x398] sm:$0xff] }
  0x40   :  { %727 = vmatprep.subr.mxu1 %v411_v9  ;;  %657 = vmatpush2.msra.mxu0 %v218_v10  ;;  %v351_v49 = vld [vmem:[#allocation5 + $0x998] sm:$0xff]  ;;  %v158_v50 = vld [vmem:[#allocation5 + $0x390] sm:$0xff]  ;;  %v153_v52 = vld [vmem:[#allocation5 + $0x368] sm:$0xff] }
  0x41   :  { %728 = vmatpush2.msra.mxu1 %v410_v11  ;;  %658 = vmatprep.subr.mxu0 %v213_v12  ;;  %v350_v51 = vld [vmem:[#allocation5 + $0x990] sm:$0xff]  ;;  %v345_v53 = vld [vmem:[#allocation5 + $0x968] sm:$0xff]  ;;  %v152_v54 = vld [vmem:[#allocation5 + $0x360] sm:$0xff] }
  0x42   :  { %729 = vmatprep.subr.mxu1 %v405_v13  ;;  %659 = vmatpush2.msra.mxu0 %v212_v14  ;;  %v344_v55 = vld [vmem:[#allocation5 + $0x960] sm:$0xff]  ;;  %v147_v56 = vld [vmem:[#allocation5 + $0x338] sm:$0xff]  ;;  %v146_v58 = vld [vmem:[#allocation5 + $0x330] sm:$0xff] }
  0x43   :  { %730 = vmatpush2.msra.mxu1 %v404_v15  ;;  %660 = vmatprep.subr.mxu0 %v207_v16  ;;  %v339_v57 = vld [vmem:[#allocation5 + $0x938] sm:$0xff]  ;;  %v338_v59 = vld [vmem:[#allocation5 + $0x930] sm:$0xff]  ;;  %v141_v60 = vld [vmem:[#allocation5 + $0x308] sm:$0xff] }
  0x44   :  { %731 = vmatprep.subr.mxu1 %v399_v17  ;;  %661 = vmatpush2.msra.mxu0 %v206_v18  ;;  %v333_v61 = vld [vmem:[#allocation5 + $0x908] sm:$0xff]  ;;  %v140_v62 = vld [vmem:[#allocation5 + $0x300] sm:$0xff]  ;;  %v1384_v63 = vld [vmem:[#allocation2 + $0x8] sm:$0xff] }
  0x45   :  { %732 = vmatpush2.msra.mxu1 %v398_v19  ;;  %662 = vmatprep.subr.mxu0 %v201_v20  ;;  %v332_v0 = vld [vmem:[#allocation5 + $0x900] sm:$0xff]  ;;  %v41_v1 = vld [vmem:[#allocation2 + $0x18] sm:$0xff]  ;;  %v1386_v2 = vld [vmem:[#allocation2] sm:$0xff] }
  0x46   :  { %733 = vmatprep.subr.mxu1 %v393_v21  ;;  %663 = vmatpush2.msra.mxu0 %v200_v22  ;;  %v40_v3 = vld [vmem:[#allocation2 + $0x10] sm:$0xff]  ;;  %v519_v4 = vld [vmem:[#allocation5 + $0xed8] sm:$0xff]  ;;  %v137_v5 = vld [vmem:[#allocation5 + $0x2e8] sm:$0xff] }
  0x47   :  { %734 = vmatpush2.msra.mxu1 %v392_v23  ;;  %664 = vmatprep.subr.mxu0 %v195_v24  ;;  %v518_v6 = vld [vmem:[#allocation5 + $0xed0] sm:$0xff]  ;;  %v136_v7 = vld [vmem:[#allocation5 + $0x2e0] sm:$0xff]  ;;  %v513_v8 = vld [vmem:[#allocation5 + $0xea8] sm:$0xff] }
  0x48   :  { %735 = vmatprep.subr.mxu1 %v387_v25  ;;  %665 = vmatpush2.msra.mxu0 %v194_v26  ;;  %v131_v9 = vld [vmem:[#allocation5 + $0x2b8] sm:$0xff]  ;;  %v512_v10 = vld [vmem:[#allocation5 + $0xea0] sm:$0xff]  ;;  %v130_v11 = vld [vmem:[#allocation5 + $0x2b0] sm:$0xff] }
  0x49   :  { %736 = vmatpush2.msra.mxu1 %v386_v27  ;;  %666 = vmatprep.subr.mxu0 %v189_v28  ;;  %v507_v12 = vld [vmem:[#allocation5 + $0xe78] sm:$0xff]  ;;  %v125_v13 = vld [vmem:[#allocation5 + $0x288] sm:$0xff]  ;;  %v506_v14 = vld [vmem:[#allocation5 + $0xe70] sm:$0xff] }
  0x4a   :  { %737 = vmatprep.subr.mxu1 %v381_v29  ;;  %667 = vmatpush2.msra.mxu0 %v188_v30  ;;  %v124_v15 = vld [vmem:[#allocation5 + $0x280] sm:$0xff]  ;;  %v501_v16 = vld [vmem:[#allocation5 + $0xe48] sm:$0xff]  ;;  %v119_v17 = vld [vmem:[#allocation5 + $0x258] sm:$0xff] }
  0x4b   :  { %738 = vmatpush2.msra.mxu1 %v380_v31  ;;  %668 = vmatprep.subr.mxu0 %v183_v32  ;;  %v500_v18 = vld [vmem:[#allocation5 + $0xe40] sm:$0xff]  ;;  %v118_v19 = vld [vmem:[#allocation5 + $0x250] sm:$0xff]  ;;  %v495_v20 = vld [vmem:[#allocation5 + $0xe18] sm:$0xff] }
  0x4c   :  { %739 = vmatprep.subr.mxu1 %v375_v33  ;;  %669 = vmatpush2.msra.mxu0 %v182_v34  ;;  %v113_v21 = vld [vmem:[#allocation5 + $0x228] sm:$0xff]  ;;  %v494_v22 = vld [vmem:[#allocation5 + $0xe10] sm:$0xff]  ;;  %v112_v23 = vld [vmem:[#allocation5 + $0x220] sm:$0xff] }
  0x4d   :  { %740 = vmatpush2.msra.mxu1 %v374_v35  ;;  %670 = vmatprep.subr.mxu0 %v177_v36  ;;  %v489_v24 = vld [vmem:[#allocation5 + $0xde8] sm:$0xff]  ;;  %v107_v25 = vld [vmem:[#allocation5 + $0x1f8] sm:$0xff]  ;;  %v488_v26 = vld [vmem:[#allocation5 + $0xde0] sm:$0xff] }
  0x4e   :  { %741 = vmatprep.subr.mxu1 %v369_v37  ;;  %671 = vmatpush2.msra.mxu0 %v176_v38  ;;  %v106_v27 = vld [vmem:[#allocation5 + $0x1f0] sm:$0xff]  ;;  %v483_v28 = vld [vmem:[#allocation5 + $0xdb8] sm:$0xff]  ;;  %v101_v29 = vld [vmem:[#allocation5 + $0x1c8] sm:$0xff] }
  0x4f   :  { %742 = vmatpush2.msra.mxu1 %v368_v39  ;;  %672 = vmatprep.subr.mxu0 %v171_v40  ;;  %v482_v30 = vld [vmem:[#allocation5 + $0xdb0] sm:$0xff]  ;;  %v100_v31 = vld [vmem:[#allocation5 + $0x1c0] sm:$0xff]  ;;  %v477_v32 = vld [vmem:[#allocation5 + $0xd88] sm:$0xff] }
  0x50   :  { %743 = vmatprep.subr.mxu1 %v363_v41  ;;  %673 = vmatpush2.msra.mxu0 %v170_v42  ;;  %v95_v33 = vld [vmem:[#allocation5 + $0x198] sm:$0xff]  ;;  %v476_v34 = vld [vmem:[#allocation5 + $0xd80] sm:$0xff]  ;;  %v94_v35 = vld [vmem:[#allocation5 + $0x190] sm:$0xff] }
  0x51   :  { %744 = vmatpush2.msra.mxu1 %v362_v43  ;;  %674 = vmatprep.subr.mxu0 %v165_v44  ;;  %v471_v36 = vld [vmem:[#allocation5 + $0xd58] sm:$0xff]  ;;  %v89_v37 = vld [vmem:[#allocation5 + $0x168] sm:$0xff]  ;;  %v470_v38 = vld [vmem:[#allocation5 + $0xd50] sm:$0xff] }
  0x52   :  { %745 = vmatprep.subr.mxu1 %v357_v45  ;;  %675 = vmatpush2.msra.mxu0 %v164_v46  ;;  %v88_v39 = vld [vmem:[#allocation5 + $0x160] sm:$0xff]  ;;  %v465_v40 = vld [vmem:[#allocation5 + $0xd28] sm:$0xff]  ;;  %v83_v41 = vld [vmem:[#allocation5 + $0x138] sm:$0xff] }
  0x53   :  { %746 = vmatpush2.msra.mxu1 %v356_v47  ;;  %676 = vmatprep.subr.mxu0 %v159_v48  ;;  %v464_v42 = vld [vmem:[#allocation5 + $0xd20] sm:$0xff]  ;;  %v82_v43 = vld [vmem:[#allocation5 + $0x130] sm:$0xff]  ;;  %v459_v44 = vld [vmem:[#allocation5 + $0xcf8] sm:$0xff] }
  0x54   :  { %747 = vmatprep.subr.mxu1 %v351_v49  ;;  %677 = vmatpush2.msra.mxu0 %v158_v50  ;;  %v77_v45 = vld [vmem:[#allocation5 + $0x108] sm:$0xff]  ;;  %v458_v46 = vld [vmem:[#allocation5 + $0xcf0] sm:$0xff]  ;;  %v76_v47 = vld [vmem:[#allocation5 + $0x100] sm:$0xff] }
  0x55   :  { %748 = vmatpush2.msra.mxu1 %v350_v51  ;;  %678 = vmatprep.subr.mxu0 %v153_v52  ;;  %v453_v48 = vld [vmem:[#allocation5 + $0xcc8] sm:$0xff]  ;;  %v71_v49 = vld [vmem:[#allocation5 + $0xd8] sm:$0xff]  ;;  %v452_v50 = vld [vmem:[#allocation5 + $0xcc0] sm:$0xff] }
  0x56   :  { %749 = vmatprep.subr.mxu1 %v345_v53  ;;  %679 = vmatpush2.msra.mxu0 %v152_v54  ;;  %v70_v51 = vld [vmem:[#allocation5 + $0xd0] sm:$0xff]  ;;  %v447_v52 = vld [vmem:[#allocation5 + $0xc98] sm:$0xff]  ;;  %v65_v53 = vld [vmem:[#allocation5 + $0xa8] sm:$0xff] }
  0x57   :  { %750 = vmatpush2.msra.mxu1 %v344_v55  ;;  %680 = vmatprep.subr.mxu0 %v147_v56  ;;  %v446_v54 = vld [vmem:[#allocation5 + $0xc90] sm:$0xff]  ;;  %v64_v55 = vld [vmem:[#allocation5 + $0xa0] sm:$0xff]  ;;  %v441_v56 = vld [vmem:[#allocation5 + $0xc68] sm:$0xff] }
  0x58   :  { %751 = vmatprep.subr.mxu1 %v339_v57  ;;  %681 = vmatpush2.msra.mxu0 %v146_v58  ;;  %v59_v57 = vld [vmem:[#allocation5 + $0x78] sm:$0xff]  ;;  %v440_v58 = vld [vmem:[#allocation5 + $0xc60] sm:$0xff] }
  0x59   :  { %752 = vmatpush2.msra.mxu1 %v338_v59  ;;  %682 = vmatprep.subr.mxu0 %v141_v60  ;;  %v58_v59 = vld [vmem:[#allocation5 + $0x70] sm:$0xff]  ;;  %v435_v60 = vld [vmem:[#allocation5 + $0xc38] sm:$0xff] }
  0x5a   :  { %753 = vmatprep.subr.mxu1 %v333_v61  ;;  %683 = vmatpush2.msra.mxu0 %v140_v62  ;;  %v53_v61 = vld [vmem:[#allocation5 + $0x48] sm:$0xff]  ;;  %v434_v62 = vld [vmem:[#allocation5 + $0xc30] sm:$0xff] }
  0x5b   :  { %684 = vmatprep.mubr.f32.mxu0 %v1384_v63  ;;  %754 = vmatpush2.msra.mxu1 %v332_v0  ;;  %v52_v0 = vld [vmem:[#allocation5 + $0x40] sm:$0xff] }
  0x5c   :  { %755 = vmatprep.mubr.f32.mxu1 %v41_v1  ;;  %685 = vmatmul.mubr.f32.vlgmr.msra.gmra.mxu0 %v1386_v2  ;;  %v429_v1 = vld [vmem:[#allocation5 + $0xc08] sm:$0xff] }
  0x5d   :  { %756 = vmatmul.mubr.f32.vlgmr.msra.gmra.mxu1 %v40_v3  ;;  %762 = vmatprep.subr.mxu0 %v519_v4  ;;  %v47_v3 = vld [vmem:[#allocation5 + $0x18] sm:$0xff]  ;;  %v428_v4 = vld [vmem:[#allocation5 + $0xc00] sm:$0xff] }
  0x5e   :  { %833 = vmatprep.subr.mxu1 %v137_v5  ;;  %763 = vmatpush1.msra.mxu0 %v518_v6  ;;  %v46_v5 = vld [vmem:[#allocation5 + $0x10] sm:$0xff]  ;;  %v615_v6 = vld [vmem:[#allocation5 + $0x11d8] sm:$0xff] }
  0x5f   :  { %834 = vmatpush1.msra.mxu1 %v136_v7  ;;  %764 = vmatprep.subr.mxu0 %v513_v8  ;;  %v233_v7 = vld [vmem:[#allocation5 + $0x5e8] sm:$0xff]  ;;  %v614_v8 = vld [vmem:[#allocation5 + $0x11d0] sm:$0xff] }
  0x60   :  { %835 = vmatprep.subr.mxu1 %v131_v9  ;;  %765 = vmatpush1.msra.mxu0 %v512_v10  ;;  %v232_v9 = vld [vmem:[#allocation5 + $0x5e0] sm:$0xff]  ;;  %v609_v10 = vld [vmem:[#allocation5 + $0x11a8] sm:$0xff] }
  0x61   :  { %836 = vmatpush1.msra.mxu1 %v130_v11  ;;  %766 = vmatprep.subr.mxu0 %v507_v12  ;;  %v227_v11 = vld [vmem:[#allocation5 + $0x5b8] sm:$0xff]  ;;  %v608_v12 = vld [vmem:[#allocation5 + $0x11a0] sm:$0xff] }
  0x62   :  { %837 = vmatprep.subr.mxu1 %v125_v13  ;;  %767 = vmatpush1.msra.mxu0 %v506_v14  ;;  %v226_v13 = vld [vmem:[#allocation5 + $0x5b0] sm:$0xff]  ;;  %v603_v14 = vld [vmem:[#allocation5 + $0x1178] sm:$0xff] }
  0x63   :  { %838 = vmatpush1.msra.mxu1 %v124_v15  ;;  %768 = vmatprep.subr.mxu0 %v501_v16  ;;  %v221_v15 = vld [vmem:[#allocation5 + $0x588] sm:$0xff]  ;;  %v602_v16 = vld [vmem:[#allocation5 + $0x1170] sm:$0xff] }
  0x64   :  { %839 = vmatprep.subr.mxu1 %v119_v17  ;;  %769 = vmatpush1.msra.mxu0 %v500_v18  ;;  %v220_v17 = vld [vmem:[#allocation5 + $0x580] sm:$0xff]  ;;  %v597_v18 = vld [vmem:[#allocation5 + $0x1148] sm:$0xff] }
  0x65   :  { %840 = vmatpush1.msra.mxu1 %v118_v19  ;;  %770 = vmatprep.subr.mxu0 %v495_v20  ;;  %v215_v19 = vld [vmem:[#allocation5 + $0x558] sm:$0xff]  ;;  %v596_v20 = vld [vmem:[#allocation5 + $0x1140] sm:$0xff] }
  0x66   :  { %841 = vmatprep.subr.mxu1 %v113_v21  ;;  %771 = vmatpush1.msra.mxu0 %v494_v22  ;;  %v214_v21 = vld [vmem:[#allocation5 + $0x550] sm:$0xff]  ;;  %v591_v22 = vld [vmem:[#allocation5 + $0x1118] sm:$0xff] }
  0x67   :  { %842 = vmatpush1.msra.mxu1 %v112_v23  ;;  %772 = vmatprep.subr.mxu0 %v489_v24  ;;  %v209_v23 = vld [vmem:[#allocation5 + $0x528] sm:$0xff]  ;;  %v590_v24 = vld [vmem:[#allocation5 + $0x1110] sm:$0xff] }
  0x68   :  { %843 = vmatprep.subr.mxu1 %v107_v25  ;;  %773 = vmatpush1.msra.mxu0 %v488_v26  ;;  %v208_v25 = vld [vmem:[#allocation5 + $0x520] sm:$0xff]  ;;  %v585_v26 = vld [vmem:[#allocation5 + $0x10e8] sm:$0xff] }
  0x69   :  { %844 = vmatpush1.msra.mxu1 %v106_v27  ;;  %774 = vmatprep.subr.mxu0 %v483_v28  ;;  %v203_v27 = vld [vmem:[#allocation5 + $0x4f8] sm:$0xff]  ;;  %v584_v28 = vld [vmem:[#allocation5 + $0x10e0] sm:$0xff] }
  0x6a   :  { %845 = vmatprep.subr.mxu1 %v101_v29  ;;  %775 = vmatpush1.msra.mxu0 %v482_v30  ;;  %v202_v29 = vld [vmem:[#allocation5 + $0x4f0] sm:$0xff]  ;;  %v579_v30 = vld [vmem:[#allocation5 + $0x10b8] sm:$0xff] }
  0x6b   :  { %846 = vmatpush1.msra.mxu1 %v100_v31  ;;  %776 = vmatprep.subr.mxu0 %v477_v32  ;;  %v197_v31 = vld [vmem:[#allocation5 + $0x4c8] sm:$0xff]  ;;  %v578_v32 = vld [vmem:[#allocation5 + $0x10b0] sm:$0xff] }
  0x6c   :  { %847 = vmatprep.subr.mxu1 %v95_v33  ;;  %777 = vmatpush1.msra.mxu0 %v476_v34  ;;  %v196_v33 = vld [vmem:[#allocation5 + $0x4c0] sm:$0xff]  ;;  %v573_v34 = vld [vmem:[#allocation5 + $0x1088] sm:$0xff] }
  0x6d   :  { %848 = vmatpush1.msra.mxu1 %v94_v35  ;;  %778 = vmatprep.subr.mxu0 %v471_v36  ;;  %v191_v35 = vld [vmem:[#allocation5 + $0x498] sm:$0xff]  ;;  %v572_v36 = vld [vmem:[#allocation5 + $0x1080] sm:$0xff] }
  0x6e   :  { %849 = vmatprep.subr.mxu1 %v89_v37  ;;  %779 = vmatpush1.msra.mxu0 %v470_v38  ;;  %v190_v37 = vld [vmem:[#allocation5 + $0x490] sm:$0xff]  ;;  %v567_v38 = vld [vmem:[#allocation5 + $0x1058] sm:$0xff] }
  0x6f   :  { %850 = vmatpush1.msra.mxu1 %v88_v39  ;;  %780 = vmatprep.subr.mxu0 %v465_v40  ;;  %v185_v39 = vld [vmem:[#allocation5 + $0x468] sm:$0xff]  ;;  %v566_v40 = vld [vmem:[#allocation5 + $0x1050] sm:$0xff] }
  0x70   :  { %851 = vmatprep.subr.mxu1 %v83_v41  ;;  %781 = vmatpush1.msra.mxu0 %v464_v42  ;;  %v184_v41 = vld [vmem:[#allocation5 + $0x460] sm:$0xff]  ;;  %v561_v42 = vld [vmem:[#allocation5 + $0x1028] sm:$0xff] }
  0x71   :  { %852 = vmatpush1.msra.mxu1 %v82_v43  ;;  %782 = vmatprep.subr.mxu0 %v459_v44  ;;  %v179_v43 = vld [vmem:[#allocation5 + $0x438] sm:$0xff]  ;;  %v560_v44 = vld [vmem:[#allocation5 + $0x1020] sm:$0xff] }
  0x72   :  { %853 = vmatprep.subr.mxu1 %v77_v45  ;;  %783 = vmatpush1.msra.mxu0 %v458_v46  ;;  %v178_v45 = vld [vmem:[#allocation5 + $0x430] sm:$0xff]  ;;  %v555_v46 = vld [vmem:[#allocation5 + $0xff8] sm:$0xff] }
  0x73   :  { %854 = vmatpush1.msra.mxu1 %v76_v47  ;;  %784 = vmatprep.subr.mxu0 %v453_v48  ;;  %v173_v47 = vld [vmem:[#allocation5 + $0x408] sm:$0xff]  ;;  %v554_v48 = vld [vmem:[#allocation5 + $0xff0] sm:$0xff] }
  0x74   :  { %855 = vmatprep.subr.mxu1 %v71_v49  ;;  %785 = vmatpush1.msra.mxu0 %v452_v50  ;;  %v172_v49 = vld [vmem:[#allocation5 + $0x400] sm:$0xff]  ;;  %v549_v50 = vld [vmem:[#allocation5 + $0xfc8] sm:$0xff] }
  0x75   :  { %856 = vmatpush1.msra.mxu1 %v70_v51  ;;  %786 = vmatprep.subr.mxu0 %v447_v52  ;;  %v167_v51 = vld [vmem:[#allocation5 + $0x3d8] sm:$0xff]  ;;  %v548_v52 = vld [vmem:[#allocation5 + $0xfc0] sm:$0xff] }
  0x76   :  { %857 = vmatprep.subr.mxu1 %v65_v53  ;;  %787 = vmatpush1.msra.mxu0 %v446_v54  ;;  %v166_v53 = vld [vmem:[#allocation5 + $0x3d0] sm:$0xff]  ;;  %v543_v54 = vld [vmem:[#allocation5 + $0xf98] sm:$0xff] }
  0x77   :  { %858 = vmatpush1.msra.mxu1 %v64_v55  ;;  %788 = vmatprep.subr.mxu0 %v441_v56  ;;  %v161_v55 = vld [vmem:[#allocation5 + $0x3a8] sm:$0xff]  ;;  %v542_v56 = vld [vmem:[#allocation5 + $0xf90] sm:$0xff] }
  0x78   :  { %859 = vmatprep.subr.mxu1 %v59_v57  ;;  %789 = vmatpush1.msra.mxu0 %v440_v58  ;;  %v160_v57 = vld [vmem:[#allocation5 + $0x3a0] sm:$0xff]  ;;  %v537_v58 = vld [vmem:[#allocation5 + $0xf68] sm:$0xff] }
  0x79   :  { %860 = vmatpush1.msra.mxu1 %v58_v59  ;;  %790 = vmatprep.subr.mxu0 %v435_v60  ;;  %v155_v59 = vld [vmem:[#allocation5 + $0x378] sm:$0xff]  ;;  %v536_v60 = vld [vmem:[#allocation5 + $0xf60] sm:$0xff] }
  0x7a   :  { %861 = vmatprep.subr.mxu1 %v53_v61  ;;  %791 = vmatpush1.msra.mxu0 %v434_v62  ;;  %v154_v61 = vld [vmem:[#allocation5 + $0x370] sm:$0xff]  ;;  %v531_v62 = vld [vmem:[#allocation5 + $0xf38] sm:$0xff] }
  0x7b   :  { %862 = vmatpush1.msra.mxu1 %v52_v0  ;;  %792 = vmatprep.subr.mxu0 %v429_v1  ;;  %v149_v0 = vld [vmem:[#allocation5 + $0x348] sm:$0xff]  ;;  %v530_v1 = vld [vmem:[#allocation5 + $0xf30] sm:$0xff] }
  0x7c   :  { %863 = vmatprep.subr.mxu1 %v47_v3  ;;  %793 = vmatpush1.msra.mxu0 %v428_v4  ;;  %v148_v3 = vld [vmem:[#allocation5 + $0x340] sm:$0xff]  ;;  %v525_v4 = vld [vmem:[#allocation5 + $0xf08] sm:$0xff] }
  0x7d   :  { %864 = vmatpush1.msra.mxu1 %v46_v5  ;;  %794 = vmatprep.subr.mxu0 %v615_v6  ;;  %v143_v5 = vld [vmem:[#allocation5 + $0x318] sm:$0xff]  ;;  %v524_v6 = vld [vmem:[#allocation5 + $0xf00] sm:$0xff] }
  0x7e   :  { %865 = vmatprep.subr.mxu1 %v233_v7  ;;  %795 = vmatpush2.msra.mxu0 %v614_v8  ;;  %v1390_v7 = vld [vmem:[#allocation2 + $0x28] sm:$0xff]  ;;  %v142_v8 = vld [vmem:[#allocation5 + $0x310] sm:$0xff] }
  0x7f   :  { %866 = vmatpush2.msra.mxu1 %v232_v9  ;;  %796 = vmatprep.subr.mxu0 %v609_v10  ;;  %v1392_v9 = vld [vmem:[#allocation2 + $0x20] sm:$0xff]  ;;  %v329_v10 = vld [vmem:[#allocation5 + $0x8e8] sm:$0xff] }
  0x80   :  { %867 = vmatprep.subr.mxu1 %v227_v11  ;;  %797 = vmatpush2.msra.mxu0 %v608_v12  ;;  %v521_v11 = vld [vmem:[#allocation5 + $0xee8] sm:$0xff]  ;;  %v328_v12 = vld [vmem:[#allocation5 + $0x8e0] sm:$0xff] }
  0x81   :  { %868 = vmatpush2.msra.mxu1 %v226_v13  ;;  %798 = vmatprep.subr.mxu0 %v603_v14  ;;  %v520_v13 = vld [vmem:[#allocation5 + $0xee0] sm:$0xff]  ;;  %v323_v14 = vld [vmem:[#allocation5 + $0x8b8] sm:$0xff] }
  0x82   :  { %869 = vmatprep.subr.mxu1 %v221_v15  ;;  %799 = vmatpush2.msra.mxu0 %v602_v16  ;;  %v515_v15 = vld [vmem:[#allocation5 + $0xeb8] sm:$0xff]  ;;  %v322_v16 = vld [vmem:[#allocation5 + $0x8b0] sm:$0xff] }
  0x83   :  { %870 = vmatpush2.msra.mxu1 %v220_v17  ;;  %800 = vmatprep.subr.mxu0 %v597_v18  ;;  %v514_v17 = vld [vmem:[#allocation5 + $0xeb0] sm:$0xff]  ;;  %v317_v18 = vld [vmem:[#allocation5 + $0x888] sm:$0xff] }
  0x84   :  { %871 = vmatprep.subr.mxu1 %v215_v19  ;;  %801 = vmatpush2.msra.mxu0 %v596_v20  ;;  %v509_v19 = vld [vmem:[#allocation5 + $0xe88] sm:$0xff]  ;;  %v316_v20 = vld [vmem:[#allocation5 + $0x880] sm:$0xff] }
  0x85   :  { %872 = vmatpush2.msra.mxu1 %v214_v21  ;;  %802 = vmatprep.subr.mxu0 %v591_v22  ;;  %v508_v21 = vld [vmem:[#allocation5 + $0xe80] sm:$0xff]  ;;  %v311_v22 = vld [vmem:[#allocation5 + $0x858] sm:$0xff] }
  0x86   :  { %873 = vmatprep.subr.mxu1 %v209_v23  ;;  %803 = vmatpush2.msra.mxu0 %v590_v24  ;;  %v310_v23 = vld [vmem:[#allocation5 + $0x850] sm:$0xff] }
  0x87   :  { %874 = vmatpush2.msra.mxu1 %v208_v25  ;;  %804 = vmatprep.subr.mxu0 %v585_v26  ;;  %v502_v24 = vld [vmem:[#allocation5 + $0xe50] sm:$0xff]  ;;  %v497_v25 = vld [vmem:[#allocation5 + $0xe28] sm:$0xff]  ;;  %v304_v26 = vld [vmem:[#allocation5 + $0x820] sm:$0xff] }
  0x88   :  { %875 = vmatprep.subr.mxu1 %v203_v27  ;;  %805 = vmatpush2.msra.mxu0 %v584_v28  ;;  %v496_v27 = vld [vmem:[#allocation5 + $0xe20] sm:$0xff]  ;;  %v299_v28 = vld [vmem:[#allocation5 + $0x7f8] sm:$0xff] }
  0x89   :  { %876 = vmatpush2.msra.mxu1 %v202_v29  ;;  %806 = vmatprep.subr.mxu0 %v579_v30  ;;  %v491_v29 = vld [vmem:[#allocation5 + $0xdf8] sm:$0xff]  ;;  %v298_v30 = vld [vmem:[#allocation5 + $0x7f0] sm:$0xff] }
  0x8a   :  { %877 = vmatprep.subr.mxu1 %v197_v31  ;;  %807 = vmatpush2.msra.mxu0 %v578_v32  ;;  %v490_v31 = vld [vmem:[#allocation5 + $0xdf0] sm:$0xff]  ;;  %v293_v32 = vld [vmem:[#allocation5 + $0x7c8] sm:$0xff] }
  0x8b   :  { %878 = vmatpush2.msra.mxu1 %v196_v33  ;;  %808 = vmatprep.subr.mxu0 %v573_v34  ;;  %v485_v33 = vld [vmem:[#allocation5 + $0xdc8] sm:$0xff]  ;;  %v292_v34 = vld [vmem:[#allocation5 + $0x7c0] sm:$0xff] }
  0x8c   :  { %879 = vmatprep.subr.mxu1 %v191_v35  ;;  %809 = vmatpush2.msra.mxu0 %v572_v36  ;;  %v484_v35 = vld [vmem:[#allocation5 + $0xdc0] sm:$0xff]  ;;  %v287_v36 = vld [vmem:[#allocation5 + $0x798] sm:$0xff] }
  0x8d   :  { %880 = vmatpush2.msra.mxu1 %v190_v37  ;;  %810 = vmatprep.subr.mxu0 %v567_v38  ;;  %v479_v37 = vld [vmem:[#allocation5 + $0xd98] sm:$0xff]  ;;  %v286_v38 = vld [vmem:[#allocation5 + $0x790] sm:$0xff] }
  0x8e   :  { %881 = vmatprep.subr.mxu1 %v185_v39  ;;  %811 = vmatpush2.msra.mxu0 %v566_v40  ;;  %v478_v39 = vld [vmem:[#allocation5 + $0xd90] sm:$0xff]  ;;  %v281_v40 = vld [vmem:[#allocation5 + $0x768] sm:$0xff] }
  0x8f   :  { %882 = vmatpush2.msra.mxu1 %v184_v41  ;;  %812 = vmatprep.subr.mxu0 %v561_v42  ;;  %v473_v41 = vld [vmem:[#allocation5 + $0xd68] sm:$0xff]  ;;  %v280_v42 = vld [vmem:[#allocation5 + $0x760] sm:$0xff] }
  0x90   :  { %883 = vmatprep.subr.mxu1 %v179_v43  ;;  %813 = vmatpush2.msra.mxu0 %v560_v44  ;;  %v472_v43 = vld [vmem:[#allocation5 + $0xd60] sm:$0xff]  ;;  %v275_v44 = vld [vmem:[#allocation5 + $0x738] sm:$0xff] }
  0x91   :  { %884 = vmatpush2.msra.mxu1 %v178_v45  ;;  %814 = vmatprep.subr.mxu0 %v555_v46  ;;  %v467_v45 = vld [vmem:[#allocation5 + $0xd38] sm:$0xff]  ;;  %v274_v46 = vld [vmem:[#allocation5 + $0x730] sm:$0xff] }
  0x92   :  { %885 = vmatprep.subr.mxu1 %v173_v47  ;;  %815 = vmatpush2.msra.mxu0 %v554_v48  ;;  %v466_v47 = vld [vmem:[#allocation5 + $0xd30] sm:$0xff]  ;;  %v269_v48 = vld [vmem:[#allocation5 + $0x708] sm:$0xff] }
  0x93   :  { %886 = vmatpush2.msra.mxu1 %v172_v49  ;;  %816 = vmatprep.subr.mxu0 %v549_v50  ;;  %v461_v49 = vld [vmem:[#allocation5 + $0xd08] sm:$0xff]  ;;  %v268_v50 = vld [vmem:[#allocation5 + $0x700] sm:$0xff] }
  0x94   :  { %887 = vmatprep.subr.mxu1 %v167_v51  ;;  %817 = vmatpush2.msra.mxu0 %v548_v52  ;;  %v460_v51 = vld [vmem:[#allocation5 + $0xd00] sm:$0xff]  ;;  %v263_v52 = vld [vmem:[#allocation5 + $0x6d8] sm:$0xff] }
  0x95   :  { %888 = vmatpush2.msra.mxu1 %v166_v53  ;;  %818 = vmatprep.subr.mxu0 %v543_v54  ;;  %v455_v53 = vld [vmem:[#allocation5 + $0xcd8] sm:$0xff]  ;;  %v262_v54 = vld [vmem:[#allocation5 + $0x6d0] sm:$0xff] }
  0x96   :  { %889 = vmatprep.subr.mxu1 %v161_v55  ;;  %819 = vmatpush2.msra.mxu0 %v542_v56  ;;  %v454_v55 = vld [vmem:[#allocation5 + $0xcd0] sm:$0xff]  ;;  %v257_v56 = vld [vmem:[#allocation5 + $0x6a8] sm:$0xff] }
  0x97   :  { %890 = vmatpush2.msra.mxu1 %v160_v57  ;;  %820 = vmatprep.subr.mxu0 %v537_v58  ;;  %v449_v57 = vld [vmem:[#allocation5 + $0xca8] sm:$0xff]  ;;  %v256_v58 = vld [vmem:[#allocation5 + $0x6a0] sm:$0xff] }
  0x98   :  { %891 = vmatprep.subr.mxu1 %v155_v59  ;;  %821 = vmatpush2.msra.mxu0 %v536_v60  ;;  %v448_v59 = vld [vmem:[#allocation5 + $0xca0] sm:$0xff]  ;;  %v251_v60 = vld [vmem:[#allocation5 + $0x678] sm:$0xff] }
  0x99   :  { %892 = vmatpush2.msra.mxu1 %v154_v61  ;;  %822 = vmatprep.subr.mxu0 %v531_v62  ;;  %v443_v61 = vld [vmem:[#allocation5 + $0xc78] sm:$0xff]  ;;  %v250_v62 = vld [vmem:[#allocation5 + $0x670] sm:$0xff] }
  0x9a   :  { %893 = vmatprep.subr.mxu1 %v149_v0  ;;  %823 = vmatpush2.msra.mxu0 %v530_v1  ;;  %v442_v0 = vld [vmem:[#allocation5 + $0xc70] sm:$0xff]  ;;  %v245_v1 = vld [vmem:[#allocation5 + $0x648] sm:$0xff] }
  0x9b   :  { %894 = vmatpush2.msra.mxu1 %v148_v3  ;;  %824 = vmatprep.subr.mxu0 %v525_v4  ;;  %v437_v3 = vld [vmem:[#allocation5 + $0xc48] sm:$0xff]  ;;  %v244_v4 = vld [vmem:[#allocation5 + $0x640] sm:$0xff] }
  0x9c   :  { %895 = vmatprep.subr.mxu1 %v143_v5  ;;  %825 = vmatpush2.msra.mxu0 %v524_v6  ;;  %v436_v5 = vld [vmem:[#allocation5 + $0xc40] sm:$0xff]  ;;  %v239_v6 = vld [vmem:[#allocation5 + $0x618] sm:$0xff] }
  0x9d   :  { %826 = vmatprep.mubr.f32.mxu0 %v1390_v7  ;;  %896 = vmatpush2.msra.mxu1 %v142_v8  ;;  %v431_v8 = vld [vmem:[#allocation5 + $0xc18] sm:$0xff] }
  0x9e   :  { %827 = vmatmul.mubr.f32.vlgmr.msra.gmra.mxu0 %v1392_v9  ;;  %897 = vmatprep.mubr.f32.mxu1 %v1384_v63  ;;  %v503_v63 = vld [vmem:[#allocation5 + $0xe58] sm:$0xff] }
  0x9f   :  { %904 = vmatprep.subr.mxu0 %v329_v10  ;;  %975 = vmatprep.subr.mxu1 %v521_v11  ;;  %v238_v10 = vld [vmem:[#allocation5 + $0x610] sm:$0xff] }
  0xa0   :  { %898 = vmatmul.mubr.f32.vlgmr.msra.gmra.mxu1 %v1386_v2  ;;  %905 = vmatpush1.msra.mxu0 %v328_v12  ;;  %v305_v2 = vld [vmem:[#allocation5 + $0x828] sm:$0xff]  ;;  %v430_v11 = vld [vmem:[#allocation5 + $0xc10] sm:$0xff] }
  0xa1   :  { %976 = vmatpush1.msra.mxu1 %v520_v13  ;;  %906 = vmatprep.subr.mxu0 %v323_v14  ;;  %v425_v12 = vld [vmem:[#allocation5 + $0xbe8] sm:$0xff]  ;;  %v424_v14 = vld [vmem:[#allocation5 + $0xbe0] sm:$0xff] }
  0xa2   :  { %977 = vmatprep.subr.mxu1 %v515_v15  ;;  %907 = vmatpush1.msra.mxu0 %v322_v16  ;;  %v617_v13 = vld [vmem:[#allocation5 + $0x11e8] sm:$0xff]  ;;  %v616_v15 = vld [vmem:[#allocation5 + $0x11e0] sm:$0xff]  ;;  %v419_v16 = vld [vmem:[#allocation5 + $0xbb8] sm:$0xff] }
  0xa3   :  { %978 = vmatpush1.msra.mxu1 %v514_v17  ;;  %908 = vmatprep.subr.mxu0 %v317_v18  ;;  %v611_v17 = vld [vmem:[#allocation5 + $0x11b8] sm:$0xff]  ;;  %v418_v18 = vld [vmem:[#allocation5 + $0xbb0] sm:$0xff] }
  0xa4   :  { %979 = vmatprep.subr.mxu1 %v509_v19  ;;  %909 = vmatpush1.msra.mxu0 %v316_v20  ;;  %v610_v19 = vld [vmem:[#allocation5 + $0x11b0] sm:$0xff]  ;;  %v413_v20 = vld [vmem:[#allocation5 + $0xb88] sm:$0xff] }
  0xa5   :  { %980 = vmatpush1.msra.mxu1 %v508_v21  ;;  %910 = vmatprep.subr.mxu0 %v311_v22  ;;  %v605_v21 = vld [vmem:[#allocation5 + $0x1188] sm:$0xff]  ;;  %v412_v22 = vld [vmem:[#allocation5 + $0xb80] sm:$0xff] }
  0xa6   :  { %981 = vmatprep.subr.mxu1 %v503_v63  ;;  %911 = vmatpush1.msra.mxu0 %v310_v23  ;;  %v604_v63 = vld [vmem:[#allocation5 + $0x1180] sm:$0xff]  ;;  %v407_v23 = vld [vmem:[#allocation5 + $0xb58] sm:$0xff] }
  0xa7   :  { %982 = vmatpush1.msra.mxu1 %v502_v24  ;;  %912 = vmatprep.subr.mxu0 %v305_v2  ;;  %v599_v24 = vld [vmem:[#allocation5 + $0x1158] sm:$0xff]  ;;  %v406_v2 = vld [vmem:[#allocation5 + $0xb50] sm:$0xff] }
  0xa8   :  { %983 = vmatprep.subr.mxu1 %v497_v25  ;;  %913 = vmatpush1.msra.mxu0 %v304_v26  ;;  %v598_v25 = vld [vmem:[#allocation5 + $0x1150] sm:$0xff]  ;;  %v401_v26 = vld [vmem:[#allocation5 + $0xb28] sm:$0xff] }
  0xa9   :  { %984 = vmatpush1.msra.mxu1 %v496_v27  ;;  %914 = vmatprep.subr.mxu0 %v299_v28  ;;  %v593_v27 = vld [vmem:[#allocation5 + $0x1128] sm:$0xff]  ;;  %v400_v28 = vld [vmem:[#allocation5 + $0xb20] sm:$0xff] }
  0xaa   :  { %985 = vmatprep.subr.mxu1 %v491_v29  ;;  %915 = vmatpush1.msra.mxu0 %v298_v30  ;;  %v592_v29 = vld [vmem:[#allocation5 + $0x1120] sm:$0xff]  ;;  %v395_v30 = vld [vmem:[#allocation5 + $0xaf8] sm:$0xff] }
  0xab   :  { %986 = vmatpush1.msra.mxu1 %v490_v31  ;;  %916 = vmatprep.subr.mxu0 %v293_v32  ;;  %v587_v31 = vld [vmem:[#allocation5 + $0x10f8] sm:$0xff]  ;;  %v394_v32 = vld [vmem:[#allocation5 + $0xaf0] sm:$0xff] }
  0xac   :  { %987 = vmatprep.subr.mxu1 %v485_v33  ;;  %917 = vmatpush1.msra.mxu0 %v292_v34  ;;  %v586_v33 = vld [vmem:[#allocation5 + $0x10f0] sm:$0xff]  ;;  %v389_v34 = vld [vmem:[#allocation5 + $0xac8] sm:$0xff] }
  0xad   :  { %988 = vmatpush1.msra.mxu1 %v484_v35  ;;  %918 = vmatprep.subr.mxu0 %v287_v36  ;;  %v581_v35 = vld [vmem:[#allocation5 + $0x10c8] sm:$0xff]  ;;  %v388_v36 = vld [vmem:[#allocation5 + $0xac0] sm:$0xff] }
  0xae   :  { %989 = vmatprep.subr.mxu1 %v479_v37  ;;  %919 = vmatpush1.msra.mxu0 %v286_v38  ;;  %v580_v37 = vld [vmem:[#allocation5 + $0x10c0] sm:$0xff]  ;;  %v383_v38 = vld [vmem:[#allocation5 + $0xa98] sm:$0xff] }
  0xaf   :  { %990 = vmatpush1.msra.mxu1 %v478_v39  ;;  %920 = vmatprep.subr.mxu0 %v281_v40  ;;  %v575_v39 = vld [vmem:[#allocation5 + $0x1098] sm:$0xff]  ;;  %v382_v40 = vld [vmem:[#allocation5 + $0xa90] sm:$0xff] }
  0xb0   :  { %991 = vmatprep.subr.mxu1 %v473_v41  ;;  %921 = vmatpush1.msra.mxu0 %v280_v42  ;;  %v574_v41 = vld [vmem:[#allocation5 + $0x1090] sm:$0xff]  ;;  %v377_v42 = vld [vmem:[#allocation5 + $0xa68] sm:$0xff] }
  0xb1   :  { %992 = vmatpush1.msra.mxu1 %v472_v43  ;;  %922 = vmatprep.subr.mxu0 %v275_v44  ;;  %v569_v43 = vld [vmem:[#allocation5 + $0x1068] sm:$0xff]  ;;  %v376_v44 = vld [vmem:[#allocation5 + $0xa60] sm:$0xff] }
  0xb2   :  { %993 = vmatprep.subr.mxu1 %v467_v45  ;;  %923 = vmatpush1.msra.mxu0 %v274_v46  ;;  %v568_v45 = vld [vmem:[#allocation5 + $0x1060] sm:$0xff]  ;;  %v371_v46 = vld [vmem:[#allocation5 + $0xa38] sm:$0xff] }
  0xb3   :  { %994 = vmatpush1.msra.mxu1 %v466_v47  ;;  %924 = vmatprep.subr.mxu0 %v269_v48  ;;  %v563_v47 = vld [vmem:[#allocation5 + $0x1038] sm:$0xff]  ;;  %v370_v48 = vld [vmem:[#allocation5 + $0xa30] sm:$0xff] }
  0xb4   :  { %995 = vmatprep.subr.mxu1 %v461_v49  ;;  %925 = vmatpush1.msra.mxu0 %v268_v50  ;;  %v562_v49 = vld [vmem:[#allocation5 + $0x1030] sm:$0xff]  ;;  %v365_v50 = vld [vmem:[#allocation5 + $0xa08] sm:$0xff] }
  0xb5   :  { %996 = vmatpush1.msra.mxu1 %v460_v51  ;;  %926 = vmatprep.subr.mxu0 %v263_v52  ;;  %v557_v51 = vld [vmem:[#allocation5 + $0x1008] sm:$0xff]  ;;  %v364_v52 = vld [vmem:[#allocation5 + $0xa00] sm:$0xff] }
  0xb6   :  { %997 = vmatprep.subr.mxu1 %v455_v53  ;;  %927 = vmatpush1.msra.mxu0 %v262_v54  ;;  %v556_v53 = vld [vmem:[#allocation5 + $0x1000] sm:$0xff]  ;;  %v359_v54 = vld [vmem:[#allocation5 + $0x9d8] sm:$0xff] }
  0xb7   :  { %998 = vmatpush1.msra.mxu1 %v454_v55  ;;  %928 = vmatprep.subr.mxu0 %v257_v56  ;;  %v551_v55 = vld [vmem:[#allocation5 + $0xfd8] sm:$0xff]  ;;  %v358_v56 = vld [vmem:[#allocation5 + $0x9d0] sm:$0xff] }
  0xb8   :  { %999 = vmatprep.subr.mxu1 %v449_v57  ;;  %929 = vmatpush1.msra.mxu0 %v256_v58  ;;  %v550_v57 = vld [vmem:[#allocation5 + $0xfd0] sm:$0xff]  ;;  %v353_v58 = vld [vmem:[#allocation5 + $0x9a8] sm:$0xff] }
  0xb9   :  { %1000 = vmatpush1.msra.mxu1 %v448_v59  ;;  %930 = vmatprep.subr.mxu0 %v251_v60  ;;  %v545_v59 = vld [vmem:[#allocation5 + $0xfa8] sm:$0xff]  ;;  %v352_v60 = vld [vmem:[#allocation5 + $0x9a0] sm:$0xff] }
  0xba   :  { %1001 = vmatprep.subr.mxu1 %v443_v61  ;;  %931 = vmatpush1.msra.mxu0 %v250_v62  ;;  %v544_v61 = vld [vmem:[#allocation5 + $0xfa0] sm:$0xff]  ;;  %v347_v62 = vld [vmem:[#allocation5 + $0x978] sm:$0xff] }
  0xbb   :  { %1002 = vmatpush1.msra.mxu1 %v442_v0  ;;  %932 = vmatprep.subr.mxu0 %v245_v1  ;;  %v539_v0 = vld [vmem:[#allocation5 + $0xf78] sm:$0xff]  ;;  %v346_v1 = vld [vmem:[#allocation5 + $0x970] sm:$0xff] }
  0xbc   :  { %1003 = vmatprep.subr.mxu1 %v437_v3  ;;  %933 = vmatpush1.msra.mxu0 %v244_v4  ;;  %v538_v3 = vld [vmem:[#allocation5 + $0xf70] sm:$0xff]  ;;  %v341_v4 = vld [vmem:[#allocation5 + $0x948] sm:$0xff] }
  0xbd   :  { %1004 = vmatpush1.msra.mxu1 %v436_v5  ;;  %934 = vmatprep.subr.mxu0 %v239_v6  ;;  %v533_v5 = vld [vmem:[#allocation5 + $0xf48] sm:$0xff]  ;;  %v340_v6 = vld [vmem:[#allocation5 + $0x940] sm:$0xff] }
  0xbe   :  { %1005 = vmatprep.subr.mxu1 %v431_v8  ;;  %935 = vmatpush1.msra.mxu0 %v238_v10  ;;  %v532_v8 = vld [vmem:[#allocation5 + $0xf40] sm:$0xff]  ;;  %v335_v10 = vld [vmem:[#allocation5 + $0x918] sm:$0xff] }
  0xbf   :  { %1006 = vmatpush1.msra.mxu1 %v430_v11  ;;  %936 = vmatprep.subr.mxu0 %v425_v12  ;;  %v527_v11 = vld [vmem:[#allocation5 + $0xf18] sm:$0xff]  ;;  %v334_v12 = vld [vmem:[#allocation5 + $0x910] sm:$0xff] }
  0xc0   :  { %1007 = vmatprep.subr.mxu1 %v617_v13  ;;  %937 = vmatpush2.msra.mxu0 %v424_v14  ;;  %v526_v13 = vld [vmem:[#allocation5 + $0xf10] sm:$0xff]  ;;  %v139_v14 = vld [vmem:[#allocation5 + $0x2f8] sm:$0xff] }
  0xc1   :  { %1008 = vmatpush2.msra.mxu1 %v616_v15  ;;  %938 = vmatprep.subr.mxu0 %v419_v16  ;;  %v1398_v15 = vld [vmem:[#allocation2 + $0x18] sm:$0xff]  ;;  %v331_v16 = vld [vmem:[#allocation5 + $0x8f8] sm:$0xff] }
  0xc2   :  { %1009 = vmatprep.subr.mxu1 %v611_v17  ;;  %939 = vmatpush2.msra.mxu0 %v418_v18  ;;  %v1401_v17 = vld [vmem:[#allocation2 + $0x10] sm:$0xff]  ;;  %v138_v18 = vld [vmem:[#allocation5 + $0x2f0] sm:$0xff] }
  0xc3   :  { %1010 = vmatpush2.msra.mxu1 %v610_v19  ;;  %940 = vmatprep.subr.mxu0 %v413_v20  ;;  %v330_v19 = vld [vmem:[#allocation5 + $0x8f0] sm:$0xff]  ;;  %v133_v20 = vld [vmem:[#allocation5 + $0x2c8] sm:$0xff] }
  0xc4   :  { %1011 = vmatprep.subr.mxu1 %v605_v21  ;;  %941 = vmatpush2.msra.mxu0 %v412_v22  ;;  %v325_v21 = vld [vmem:[#allocation5 + $0x8c8] sm:$0xff]  ;;  %v132_v22 = vld [vmem:[#allocation5 + $0x2c0] sm:$0xff] }
  0xc5   :  { %1012 = vmatpush2.msra.mxu1 %v604_v63  ;;  %942 = vmatprep.subr.mxu0 %v407_v23  ;;  %v324_v63 = vld [vmem:[#allocation5 + $0x8c0] sm:$0xff]  ;;  %v127_v23 = vld [vmem:[#allocation5 + $0x298] sm:$0xff] }
  0xc6   :  { %1013 = vmatprep.subr.mxu1 %v599_v24  ;;  %943 = vmatpush2.msra.mxu0 %v406_v2  ;;  %v319_v24 = vld [vmem:[#allocation5 + $0x898] sm:$0xff]  ;;  %v126_v2 = vld [vmem:[#allocation5 + $0x290] sm:$0xff] }
  0xc7   :  { %1014 = vmatpush2.msra.mxu1 %v598_v25  ;;  %944 = vmatprep.subr.mxu0 %v401_v26  ;;  %v318_v25 = vld [vmem:[#allocation5 + $0x890] sm:$0xff]  ;;  %v121_v26 = vld [vmem:[#allocation5 + $0x268] sm:$0xff] }
  0xc8   :  { %1015 = vmatprep.subr.mxu1 %v593_v27  ;;  %945 = vmatpush2.msra.mxu0 %v400_v28  ;;  %v120_v27 = vld [vmem:[#allocation5 + $0x260] sm:$0xff] }
  0xc9   :  { %1016 = vmatpush2.msra.mxu1 %v592_v29  ;;  %946 = vmatprep.subr.mxu0 %v395_v30  ;;  %v312_v28 = vld [vmem:[#allocation5 + $0x860] sm:$0xff]  ;;  %v307_v29 = vld [vmem:[#allocation5 + $0x838] sm:$0xff]  ;;  %v114_v30 = vld [vmem:[#allocation5 + $0x230] sm:$0xff] }
  0xca   :  { %1017 = vmatprep.subr.mxu1 %v587_v31  ;;  %947 = vmatpush2.msra.mxu0 %v394_v32  ;;  %v306_v31 = vld [vmem:[#allocation5 + $0x830] sm:$0xff]  ;;  %v109_v32 = vld [vmem:[#allocation5 + $0x208] sm:$0xff] }
  0xcb   :  { %1018 = vmatpush2.msra.mxu1 %v586_v33  ;;  %948 = vmatprep.subr.mxu0 %v389_v34  ;;  %v301_v33 = vld [vmem:[#allocation5 + $0x808] sm:$0xff]  ;;  %v108_v34 = vld [vmem:[#allocation5 + $0x200] sm:$0xff] }
  0xcc   :  { %1019 = vmatprep.subr.mxu1 %v581_v35  ;;  %949 = vmatpush2.msra.mxu0 %v388_v36  ;;  %v300_v35 = vld [vmem:[#allocation5 + $0x800] sm:$0xff]  ;;  %v103_v36 = vld [vmem:[#allocation5 + $0x1d8] sm:$0xff] }
  0xcd   :  { %1020 = vmatpush2.msra.mxu1 %v580_v37  ;;  %950 = vmatprep.subr.mxu0 %v383_v38  ;;  %v295_v37 = vld [vmem:[#allocation5 + $0x7d8] sm:$0xff]  ;;  %v102_v38 = vld [vmem:[#allocation5 + $0x1d0] sm:$0xff] }
  0xce   :  { %1021 = vmatprep.subr.mxu1 %v575_v39  ;;  %951 = vmatpush2.msra.mxu0 %v382_v40  ;;  %v294_v39 = vld [vmem:[#allocation5 + $0x7d0] sm:$0xff]  ;;  %v97_v40 = vld [vmem:[#allocation5 + $0x1a8] sm:$0xff] }
  0xcf   :  { %1022 = vmatpush2.msra.mxu1 %v574_v41  ;;  %952 = vmatprep.subr.mxu0 %v377_v42  ;;  %v289_v41 = vld [vmem:[#allocation5 + $0x7a8] sm:$0xff]  ;;  %v96_v42 = vld [vmem:[#allocation5 + $0x1a0] sm:$0xff] }
  0xd0   :  { %1023 = vmatprep.subr.mxu1 %v569_v43  ;;  %953 = vmatpush2.msra.mxu0 %v376_v44  ;;  %v288_v43 = vld [vmem:[#allocation5 + $0x7a0] sm:$0xff]  ;;  %v91_v44 = vld [vmem:[#allocation5 + $0x178] sm:$0xff] }
  0xd1   :  { %1024 = vmatpush2.msra.mxu1 %v568_v45  ;;  %954 = vmatprep.subr.mxu0 %v371_v46  ;;  %v283_v45 = vld [vmem:[#allocation5 + $0x778] sm:$0xff]  ;;  %v90_v46 = vld [vmem:[#allocation5 + $0x170] sm:$0xff] }
  0xd2   :  { %1025 = vmatprep.subr.mxu1 %v563_v47  ;;  %955 = vmatpush2.msra.mxu0 %v370_v48  ;;  %v282_v47 = vld [vmem:[#allocation5 + $0x770] sm:$0xff]  ;;  %v85_v48 = vld [vmem:[#allocation5 + $0x148] sm:$0xff] }
  0xd3   :  { %1026 = vmatpush2.msra.mxu1 %v562_v49  ;;  %956 = vmatprep.subr.mxu0 %v365_v50  ;;  %v277_v49 = vld [vmem:[#allocation5 + $0x748] sm:$0xff]  ;;  %v84_v50 = vld [vmem:[#allocation5 + $0x140] sm:$0xff] }
  0xd4   :  { %1027 = vmatprep.subr.mxu1 %v557_v51  ;;  %957 = vmatpush2.msra.mxu0 %v364_v52  ;;  %v276_v51 = vld [vmem:[#allocation5 + $0x740] sm:$0xff]  ;;  %v79_v52 = vld [vmem:[#allocation5 + $0x118] sm:$0xff] }
  0xd5   :  { %1028 = vmatpush2.msra.mxu1 %v556_v53  ;;  %958 = vmatprep.subr.mxu0 %v359_v54  ;;  %v271_v53 = vld [vmem:[#allocation5 + $0x718] sm:$0xff]  ;;  %v78_v54 = vld [vmem:[#allocation5 + $0x110] sm:$0xff] }
  0xd6   :  { %1029 = vmatprep.subr.mxu1 %v551_v55  ;;  %959 = vmatpush2.msra.mxu0 %v358_v56  ;;  %v270_v55 = vld [vmem:[#allocation5 + $0x710] sm:$0xff]  ;;  %v73_v56 = vld [vmem:[#allocation5 + $0xe8] sm:$0xff] }
  0xd7   :  { %1030 = vmatpush2.msra.mxu1 %v550_v57  ;;  %960 = vmatprep.subr.mxu0 %v353_v58  ;;  %v265_v57 = vld [vmem:[#allocation5 + $0x6e8] sm:$0xff]  ;;  %v72_v58 = vld [vmem:[#allocation5 + $0xe0] sm:$0xff] }
  0xd8   :  { %1031 = vmatprep.subr.mxu1 %v545_v59  ;;  %961 = vmatpush2.msra.mxu0 %v352_v60  ;;  %v264_v59 = vld [vmem:[#allocation5 + $0x6e0] sm:$0xff]  ;;  %v67_v60 = vld [vmem:[#allocation5 + $0xb8] sm:$0xff] }
  0xd9   :  { %1032 = vmatpush2.msra.mxu1 %v544_v61  ;;  %962 = vmatprep.subr.mxu0 %v347_v62  ;;  %v259_v61 = vld [vmem:[#allocation5 + $0x6b8] sm:$0xff]  ;;  %v66_v62 = vld [vmem:[#allocation5 + $0xb0] sm:$0xff] }
  0xda   :  { %1033 = vmatprep.subr.mxu1 %v539_v0  ;;  %963 = vmatpush2.msra.mxu0 %v346_v1  ;;  %v258_v0 = vld [vmem:[#allocation5 + $0x6b0] sm:$0xff]  ;;  %v61_v1 = vld [vmem:[#allocation5 + $0x88] sm:$0xff] }
  0xdb   :  { %1034 = vmatpush2.msra.mxu1 %v538_v3  ;;  %964 = vmatprep.subr.mxu0 %v341_v4  ;;  %v253_v3 = vld [vmem:[#allocation5 + $0x688] sm:$0xff]  ;;  %v60_v4 = vld [vmem:[#allocation5 + $0x80] sm:$0xff] }
  0xdc   :  { %1035 = vmatprep.subr.mxu1 %v533_v5  ;;  %965 = vmatpush2.msra.mxu0 %v340_v6  ;;  %v252_v5 = vld [vmem:[#allocation5 + $0x680] sm:$0xff]  ;;  %v55_v6 = vld [vmem:[#allocation5 + $0x58] sm:$0xff] }
  0xdd   :  { %1036 = vmatpush2.msra.mxu1 %v532_v8  ;;  %966 = vmatprep.subr.mxu0 %v335_v10  ;;  %v247_v8 = vld [vmem:[#allocation5 + $0x658] sm:$0xff]  ;;  %v54_v10 = vld [vmem:[#allocation5 + $0x50] sm:$0xff] }
  0xde   :  { %1037 = vmatprep.subr.mxu1 %v527_v11  ;;  %967 = vmatpush2.msra.mxu0 %v334_v12  ;;  %v246_v11 = vld [vmem:[#allocation5 + $0x650] sm:$0xff]  ;;  %v49_v12 = vld [vmem:[#allocation5 + $0x28] sm:$0xff] }
  0xdf   :  { %968 = vmatprep.mubr.f32.mxu0 %v1398_v15  ;;  %1038 = vmatpush2.msra.mxu1 %v526_v13  ;;  %v241_v13 = vld [vmem:[#allocation5 + $0x628] sm:$0xff] }
  0xe0   :  { %969 = vmatmul.mubr.f32.vlgmr.msra.gmra.mxu0 %v1401_v17  ;;  %1039 = vmatprep.mubr.f32.mxu1 %v1390_v7  ;;  %v313_v7 = vld [vmem:[#allocation5 + $0x868] sm:$0xff] }
  0xe1   :  { %1046 = vmatprep.subr.mxu0 %v139_v14  ;;  %1117 = vmatprep.subr.mxu1 %v331_v16  ;;  %v48_v14 = vld [vmem:[#allocation5 + $0x20] sm:$0xff] }
  0xe2   :  { %1040 = vmatmul.mubr.f32.vlgmr.msra.gmra.mxu1 %v1392_v9  ;;  %1047 = vmatpush1.msra.mxu0 %v138_v18  ;;  %v115_v9 = vld [vmem:[#allocation5 + $0x238] sm:$0xff]  ;;  %v240_v16 = vld [vmem:[#allocation5 + $0x620] sm:$0xff] }
  0xe3   :  { %1118 = vmatpush1.msra.mxu1 %v330_v19  ;;  %1048 = vmatprep.subr.mxu0 %v133_v20  ;;  %v235_v18 = vld [vmem:[#allocation5 + $0x5f8] sm:$0xff]  ;;  %v234_v20 = vld [vmem:[#allocation5 + $0x5f0] sm:$0xff] }
  0xe4   :  { %1119 = vmatprep.subr.mxu1 %v325_v21  ;;  %1049 = vmatpush1.msra.mxu0 %v132_v22  ;;  %v427_v19 = vld [vmem:[#allocation5 + $0xbf8] sm:$0xff]  ;;  %v426_v21 = vld [vmem:[#allocation5 + $0xbf0] sm:$0xff]  ;;  %v229_v22 = vld [vmem:[#allocation5 + $0x5c8] sm:$0xff] }
  0xe5   :  { %1120 = vmatpush1.msra.mxu1 %v324_v63  ;;  %1050 = vmatprep.subr.mxu0 %v127_v23  ;;  %v421_v63 = vld [vmem:[#allocation5 + $0xbc8] sm:$0xff]  ;;  %v228_v23 = vld [vmem:[#allocation5 + $0x5c0] sm:$0xff] }
  0xe6   :  { %1121 = vmatprep.subr.mxu1 %v319_v24  ;;  %1051 = vmatpush1.msra.mxu0 %v126_v2  ;;  %v420_v24 = vld [vmem:[#allocation5 + $0xbc0] sm:$0xff]  ;;  %v223_v2 = vld [vmem:[#allocation5 + $0x598] sm:$0xff] }
  0xe7   :  { %1122 = vmatpush1.msra.mxu1 %v318_v25  ;;  %1052 = vmatprep.subr.mxu0 %v121_v26  ;;  %v415_v25 = vld [vmem:[#allocation5 + $0xb98] sm:$0xff]  ;;  %v222_v26 = vld [vmem:[#allocation5 + $0x590] sm:$0xff] }
  0xe8   :  { %1123 = vmatprep.subr.mxu1 %v313_v7  ;;  %1053 = vmatpush1.msra.mxu0 %v120_v27  ;;  %v414_v7 = vld [vmem:[#allocation5 + $0xb90] sm:$0xff]  ;;  %v217_v27 = vld [vmem:[#allocation5 + $0x568] sm:$0xff] }
  0xe9   :  { %1124 = vmatpush1.msra.mxu1 %v312_v28  ;;  %1054 = vmatprep.subr.mxu0 %v115_v9  ;;  %v409_v28 = vld [vmem:[#allocation5 + $0xb68] sm:$0xff]  ;;  %v216_v9 = vld [vmem:[#allocation5 + $0x560] sm:$0xff] }
  0xea   :  { %1125 = vmatprep.subr.mxu1 %v307_v29  ;;  %1055 = vmatpush1.msra.mxu0 %v114_v30  ;;  %v408_v29 = vld [vmem:[#allocation5 + $0xb60] sm:$0xff]  ;;  %v211_v30 = vld [vmem:[#allocation5 + $0x538] sm:$0xff] }
  0xeb   :  { %1126 = vmatpush1.msra.mxu1 %v306_v31  ;;  %1056 = vmatprep.subr.mxu0 %v109_v32  ;;  %v403_v31 = vld [vmem:[#allocation5 + $0xb38] sm:$0xff]  ;;  %v210_v32 = vld [vmem:[#allocation5 + $0x530] sm:$0xff] }
  0xec   :  { %1127 = vmatprep.subr.mxu1 %v301_v33  ;;  %1057 = vmatpush1.msra.mxu0 %v108_v34  ;;  %v402_v33 = vld [vmem:[#allocation5 + $0xb30] sm:$0xff]  ;;  %v205_v34 = vld [vmem:[#allocation5 + $0x508] sm:$0xff] }
  0xed   :  { %1128 = vmatpush1.msra.mxu1 %v300_v35  ;;  %1058 = vmatprep.subr.mxu0 %v103_v36  ;;  %v397_v35 = vld [vmem:[#allocation5 + $0xb08] sm:$0xff]  ;;  %v204_v36 = vld [vmem:[#allocation5 + $0x500] sm:$0xff] }
  0xee   :  { %1129 = vmatprep.subr.mxu1 %v295_v37  ;;  %1059 = vmatpush1.msra.mxu0 %v102_v38  ;;  %v396_v37 = vld [vmem:[#allocation5 + $0xb00] sm:$0xff]  ;;  %v199_v38 = vld [vmem:[#allocation5 + $0x4d8] sm:$0xff] }
  0xef   :  { %1130 = vmatpush1.msra.mxu1 %v294_v39  ;;  %1060 = vmatprep.subr.mxu0 %v97_v40  ;;  %v391_v39 = vld [vmem:[#allocation5 + $0xad8] sm:$0xff]  ;;  %v198_v40 = vld [vmem:[#allocation5 + $0x4d0] sm:$0xff] }
  0xf0   :  { %1131 = vmatprep.subr.mxu1 %v289_v41  ;;  %1061 = vmatpush1.msra.mxu0 %v96_v42  ;;  %v390_v41 = vld [vmem:[#allocation5 + $0xad0] sm:$0xff]  ;;  %v193_v42 = vld [vmem:[#allocation5 + $0x4a8] sm:$0xff] }
  0xf1   :  { %1132 = vmatpush1.msra.mxu1 %v288_v43  ;;  %1062 = vmatprep.subr.mxu0 %v91_v44  ;;  %v385_v43 = vld [vmem:[#allocation5 + $0xaa8] sm:$0xff]  ;;  %v192_v44 = vld [vmem:[#allocation5 + $0x4a0] sm:$0xff] }
  0xf2   :  { %1133 = vmatprep.subr.mxu1 %v283_v45  ;;  %1063 = vmatpush1.msra.mxu0 %v90_v46  ;;  %v384_v45 = vld [vmem:[#allocation5 + $0xaa0] sm:$0xff]  ;;  %v187_v46 = vld [vmem:[#allocation5 + $0x478] sm:$0xff] }
  0xf3   :  { %1134 = vmatpush1.msra.mxu1 %v282_v47  ;;  %1064 = vmatprep.subr.mxu0 %v85_v48  ;;  %v379_v47 = vld [vmem:[#allocation5 + $0xa78] sm:$0xff]  ;;  %v186_v48 = vld [vmem:[#allocation5 + $0x470] sm:$0xff] }
  0xf4   :  { %1135 = vmatprep.subr.mxu1 %v277_v49  ;;  %1065 = vmatpush1.msra.mxu0 %v84_v50  ;;  %v378_v49 = vld [vmem:[#allocation5 + $0xa70] sm:$0xff]  ;;  %v181_v50 = vld [vmem:[#allocation5 + $0x448] sm:$0xff] }
  0xf5   :  { %1136 = vmatpush1.msra.mxu1 %v276_v51  ;;  %1066 = vmatprep.subr.mxu0 %v79_v52  ;;  %v373_v51 = vld [vmem:[#allocation5 + $0xa48] sm:$0xff]  ;;  %v180_v52 = vld [vmem:[#allocation5 + $0x440] sm:$0xff] }
  0xf6   :  { %1137 = vmatprep.subr.mxu1 %v271_v53  ;;  %1067 = vmatpush1.msra.mxu0 %v78_v54  ;;  %v372_v53 = vld [vmem:[#allocation5 + $0xa40] sm:$0xff]  ;;  %v175_v54 = vld [vmem:[#allocation5 + $0x418] sm:$0xff] }
  0xf7   :  { %1138 = vmatpush1.msra.mxu1 %v270_v55  ;;  %1068 = vmatprep.subr.mxu0 %v73_v56  ;;  %v367_v55 = vld [vmem:[#allocation5 + $0xa18] sm:$0xff]  ;;  %v174_v56 = vld [vmem:[#allocation5 + $0x410] sm:$0xff] }
  0xf8   :  { %1139 = vmatprep.subr.mxu1 %v265_v57  ;;  %1069 = vmatpush1.msra.mxu0 %v72_v58  ;;  %v366_v57 = vld [vmem:[#allocation5 + $0xa10] sm:$0xff]  ;;  %v169_v58 = vld [vmem:[#allocation5 + $0x3e8] sm:$0xff] }
  0xf9   :  { %1140 = vmatpush1.msra.mxu1 %v264_v59  ;;  %1070 = vmatprep.subr.mxu0 %v67_v60  ;;  %v361_v59 = vld [vmem:[#allocation5 + $0x9e8] sm:$0xff]  ;;  %v168_v60 = vld [vmem:[#allocation5 + $0x3e0] sm:$0xff] }
  0xfa   :  { %1141 = vmatprep.subr.mxu1 %v259_v61  ;;  %1071 = vmatpush1.msra.mxu0 %v66_v62  ;;  %v360_v61 = vld [vmem:[#allocation5 + $0x9e0] sm:$0xff]  ;;  %v163_v62 = vld [vmem:[#allocation5 + $0x3b8] sm:$0xff] }
  0xfb   :  { %1142 = vmatpush1.msra.mxu1 %v258_v0  ;;  %1072 = vmatprep.subr.mxu0 %v61_v1  ;;  %v355_v0 = vld [vmem:[#allocation5 + $0x9b8] sm:$0xff]  ;;  %v162_v1 = vld [vmem:[#allocation5 + $0x3b0] sm:$0xff] }
  0xfc   :  { %1143 = vmatprep.subr.mxu1 %v253_v3  ;;  %1073 = vmatpush1.msra.mxu0 %v60_v4  ;;  %v354_v3 = vld [vmem:[#allocation5 + $0x9b0] sm:$0xff]  ;;  %v157_v4 = vld [vmem:[#allocation5 + $0x388] sm:$0xff] }
  0xfd   :  { %1144 = vmatpush1.msra.mxu1 %v252_v5  ;;  %1074 = vmatprep.subr.mxu0 %v55_v6  ;;  %v349_v5 = vld [vmem:[#allocation5 + $0x988] sm:$0xff]  ;;  %v156_v6 = vld [vmem:[#allocation5 + $0x380] sm:$0xff] }
  0xfe   :  { %1145 = vmatprep.subr.mxu1 %v247_v8  ;;  %1075 = vmatpush1.msra.mxu0 %v54_v10  ;;  %v348_v8 = vld [vmem:[#allocation5 + $0x980] sm:$0xff]  ;;  %v151_v10 = vld [vmem:[#allocation5 + $0x358] sm:$0xff] }
  0xff   :  { %1146 = vmatpush1.msra.mxu1 %v246_v11  ;;  %1076 = vmatprep.subr.mxu0 %v49_v12  ;;  %v343_v11 = vld [vmem:[#allocation5 + $0x958] sm:$0xff]  ;;  %v150_v12 = vld [vmem:[#allocation5 + $0x350] sm:$0xff] }
 0x100   :  { %1147 = vmatprep.subr.mxu1 %v241_v13  ;;  %1077 = vmatpush1.msra.mxu0 %v48_v14  ;;  %v342_v13 = vld [vmem:[#allocation5 + $0x950] sm:$0xff]  ;;  %v145_v14 = vld [vmem:[#allocation5 + $0x328] sm:$0xff] }
 0x101   :  { %1148 = vmatpush1.msra.mxu1 %v240_v16  ;;  %1078 = vmatprep.subr.mxu0 %v235_v18  ;;  %v337_v16 = vld [vmem:[#allocation5 + $0x928] sm:$0xff]  ;;  %v144_v18 = vld [vmem:[#allocation5 + $0x320] sm:$0xff] }
 0x102   :  { %1149 = vmatprep.subr.mxu1 %v427_v19  ;;  %1079 = vmatpush2.msra.mxu0 %v234_v20  ;;  %v336_v19 = vld [vmem:[#allocation5 + $0x920] sm:$0xff]  ;;  %v1288_v20 = vld [vmem:[#allocation2 + $0x8] sm:$0xff] }
 0x103   :  { %1150 = vmatpush2.msra.mxu1 %v426_v21  ;;  %1080 = vmatprep.subr.mxu0 %v229_v22  ;;  %v523_v21 = vld [vmem:[#allocation5 + $0xef8] sm:$0xff]  ;;  %v522_v22 = vld [vmem:[#allocation5 + $0xef0] sm:$0xff] }
 0x104   :  { %1151 = vmatprep.subr.mxu1 %v421_v63  ;;  %1081 = vmatpush2.msra.mxu0 %v228_v23  ;;  %v1289_v63 = vld [vmem:[#allocation2] sm:$0xff]  ;;  %v517_v23 = vld [vmem:[#allocation5 + $0xec8] sm:$0xff] }
 0x105   :  { %1152 = vmatpush2.msra.mxu1 %v420_v24  ;;  %1082 = vmatprep.subr.mxu0 %v223_v2  ;;  %v516_v24 = vld [vmem:[#allocation5 + $0xec0] sm:$0xff]  ;;  %v1290_v2 = vld [vmem:[#allocation2 + $0x28] sm:$0xff] }
 0x106   :  { %1153 = vmatprep.subr.mxu1 %v415_v25  ;;  %1083 = vmatpush2.msra.mxu0 %v222_v26  ;;  %v511_v25 = vld [vmem:[#allocation5 + $0xe98] sm:$0xff]  ;;  %v510_v26 = vld [vmem:[#allocation5 + $0xe90] sm:$0xff] }
 0x107   :  { %1154 = vmatpush2.msra.mxu1 %v414_v7  ;;  %1084 = vmatprep.subr.mxu0 %v217_v27  ;;  %v505_v7 = vld [vmem:[#allocation5 + $0xe68] sm:$0xff]  ;;  %v504_v27 = vld [vmem:[#allocation5 + $0xe60] sm:$0xff] }
 0x108   :  { %1155 = vmatprep.subr.mxu1 %v409_v28  ;;  %1085 = vmatpush2.msra.mxu0 %v216_v9  ;;  %v498_v28 = vld [vmem:[#allocation5 + $0xe30] sm:$0xff]  ;;  %v493_v9 = vld [vmem:[#allocation5 + $0xe08] sm:$0xff] }
 0x109   :  { %1156 = vmatpush2.msra.mxu1 %v408_v29  ;;  %1086 = vmatprep.subr.mxu0 %v211_v30  ;;  %v487_v29 = vld [vmem:[#allocation5 + $0xdd8] sm:$0xff]  ;;  %v486_v30 = vld [vmem:[#allocation5 + $0xdd0] sm:$0xff] }
 0x10a   :  { %1157 = vmatprep.subr.mxu1 %v403_v31  ;;  %1087 = vmatpush2.msra.mxu0 %v210_v32  ;;  %v481_v31 = vld [vmem:[#allocation5 + $0xda8] sm:$0xff]  ;;  %v480_v32 = vld [vmem:[#allocation5 + $0xda0] sm:$0xff] }
 0x10b   :  { %1158 = vmatpush2.msra.mxu1 %v402_v33  ;;  %1088 = vmatprep.subr.mxu0 %v205_v34  ;;  %v475_v33 = vld [vmem:[#allocation5 + $0xd78] sm:$0xff]  ;;  %v474_v34 = vld [vmem:[#allocation5 + $0xd70] sm:$0xff] }
 0x10c   :  { %1159 = vmatprep.subr.mxu1 %v397_v35  ;;  %1089 = vmatpush2.msra.mxu0 %v204_v36  ;;  %v469_v35 = vld [vmem:[#allocation5 + $0xd48] sm:$0xff]  ;;  %v468_v36 = vld [vmem:[#allocation5 + $0xd40] sm:$0xff] }
 0x10d   :  { %1160 = vmatpush2.msra.mxu1 %v396_v37  ;;  %1090 = vmatprep.subr.mxu0 %v199_v38  ;;  %v463_v37 = vld [vmem:[#allocation5 + $0xd18] sm:$0xff]  ;;  %v462_v38 = vld [vmem:[#allocation5 + $0xd10] sm:$0xff] }
 0x10e   :  { %1161 = vmatprep.subr.mxu1 %v391_v39  ;;  %1091 = vmatpush2.msra.mxu0 %v198_v40  ;;  %v457_v39 = vld [vmem:[#allocation5 + $0xce8] sm:$0xff]  ;;  %v456_v40 = vld [vmem:[#allocation5 + $0xce0] sm:$0xff] }
 0x10f   :  { %1162 = vmatpush2.msra.mxu1 %v390_v41  ;;  %1092 = vmatprep.subr.mxu0 %v193_v42  ;;  %v451_v41 = vld [vmem:[#allocation5 + $0xcb8] sm:$0xff]  ;;  %v450_v42 = vld [vmem:[#allocation5 + $0xcb0] sm:$0xff] }
 0x110   :  { %1163 = vmatprep.subr.mxu1 %v385_v43  ;;  %1093 = vmatpush2.msra.mxu0 %v192_v44  ;;  %v445_v43 = vld [vmem:[#allocation5 + $0xc88] sm:$0xff]  ;;  %v444_v44 = vld [vmem:[#allocation5 + $0xc80] sm:$0xff] }
 0x111   :  { %1164 = vmatpush2.msra.mxu1 %v384_v45  ;;  %1094 = vmatprep.subr.mxu0 %v187_v46  ;;  %v439_v45 = vld [vmem:[#allocation5 + $0xc58] sm:$0xff]  ;;  %v438_v46 = vld [vmem:[#allocation5 + $0xc50] sm:$0xff] }
 0x112   :  { %1165 = vmatprep.subr.mxu1 %v379_v47  ;;  %1095 = vmatpush2.msra.mxu0 %v186_v48  ;;  %v433_v47 = vld [vmem:[#allocation5 + $0xc28] sm:$0xff]  ;;  %v432_v48 = vld [vmem:[#allocation5 + $0xc20] sm:$0xff] }
 0x113   :  { %1166 = vmatpush2.msra.mxu1 %v378_v49  ;;  %1096 = vmatprep.subr.mxu0 %v181_v50  ;;  %v619_v49 = vld [vmem:[#allocation5 + $0x11f8] sm:$0xff]  ;;  %v618_v50 = vld [vmem:[#allocation5 + $0x11f0] sm:$0xff] }
 0x114   :  { %1167 = vmatprep.subr.mxu1 %v373_v51  ;;  %1097 = vmatpush2.msra.mxu0 %v180_v52  ;;  %v613_v51 = vld [vmem:[#allocation5 + $0x11c8] sm:$0xff]  ;;  %v612_v52 = vld [vmem:[#allocation5 + $0x11c0] sm:$0xff] }
 0x115   :  { %1168 = vmatpush2.msra.mxu1 %v372_v53  ;;  %1098 = vmatprep.subr.mxu0 %v175_v54  ;;  %v607_v53 = vld [vmem:[#allocation5 + $0x1198] sm:$0xff]  ;;  %v606_v54 = vld [vmem:[#allocation5 + $0x1190] sm:$0xff] }
 0x116   :  { %1169 = vmatprep.subr.mxu1 %v367_v55  ;;  %1099 = vmatpush2.msra.mxu0 %v174_v56  ;;  %v601_v55 = vld [vmem:[#allocation5 + $0x1168] sm:$0xff]  ;;  %v600_v56 = vld [vmem:[#allocation5 + $0x1160] sm:$0xff] }
 0x117   :  { %1170 = vmatpush2.msra.mxu1 %v366_v57  ;;  %1100 = vmatprep.subr.mxu0 %v169_v58  ;;  %v595_v57 = vld [vmem:[#allocation5 + $0x1138] sm:$0xff]  ;;  %v594_v58 = vld [vmem:[#allocation5 + $0x1130] sm:$0xff] }
 0x118   :  { %1171 = vmatprep.subr.mxu1 %v361_v59  ;;  %1101 = vmatpush2.msra.mxu0 %v168_v60  ;;  %v589_v59 = vld [vmem:[#allocation5 + $0x1108] sm:$0xff]  ;;  %v588_v60 = vld [vmem:[#allocation5 + $0x1100] sm:$0xff] }
 0x119   :  { %1172 = vmatpush2.msra.mxu1 %v360_v61  ;;  %1102 = vmatprep.subr.mxu0 %v163_v62  ;;  %v583_v61 = vld [vmem:[#allocation5 + $0x10d8] sm:$0xff]  ;;  %v582_v62 = vld [vmem:[#allocation5 + $0x10d0] sm:$0xff] }
 0x11a   :  { %1173 = vmatprep.subr.mxu1 %v355_v0  ;;  %1103 = vmatpush2.msra.mxu0 %v162_v1  ;;  %v577_v0 = vld [vmem:[#allocation5 + $0x10a8] sm:$0xff]  ;;  %v576_v1 = vld [vmem:[#allocation5 + $0x10a0] sm:$0xff] }
 0x11b   :  { %1174 = vmatpush2.msra.mxu1 %v354_v3  ;;  %1104 = vmatprep.subr.mxu0 %v157_v4  ;;  %v571_v3 = vld [vmem:[#allocation5 + $0x1078] sm:$0xff]  ;;  %v570_v4 = vld [vmem:[#allocation5 + $0x1070] sm:$0xff] }
 0x11c   :  { %1175 = vmatprep.subr.mxu1 %v349_v5  ;;  %1105 = vmatpush2.msra.mxu0 %v156_v6  ;;  %v565_v5 = vld [vmem:[#allocation5 + $0x1048] sm:$0xff]  ;;  %v564_v6 = vld [vmem:[#allocation5 + $0x1040] sm:$0xff] }
 0x11d   :  { %1176 = vmatpush2.msra.mxu1 %v348_v8  ;;  %1106 = vmatprep.subr.mxu0 %v151_v10  ;;  %v559_v8 = vld [vmem:[#allocation5 + $0x1018] sm:$0xff]  ;;  %v558_v10 = vld [vmem:[#allocation5 + $0x1010] sm:$0xff] }
 0x11e   :  { %1177 = vmatprep.subr.mxu1 %v343_v11  ;;  %1107 = vmatpush2.msra.mxu0 %v150_v12  ;;  %v553_v11 = vld [vmem:[#allocation5 + $0xfe8] sm:$0xff]  ;;  %v686_v12 = vpop.f32.mrf.mxu0 }
 0x11f   :  { %1178 = vmatpush2.msra.mxu1 %v342_v13  ;;  %1108 = vmatprep.subr.mxu0 %v145_v14  ;;  %v757_v13 = vpop.f32.mrf.mxu1  ;;  %v552_v14 = vld [vmem:[#allocation5 + $0xfe0] sm:$0xff] }
 0x120   :  { %1179 = vmatprep.subr.mxu1 %v337_v16  ;;  %1109 = vmatpush2.msra.mxu0 %v144_v18  ;;  %v547_v16 = vld [vmem:[#allocation5 + $0xfb8] sm:$0xff]  ;;  %v546_v18 = vld [vmem:[#allocation5 + $0xfb0] sm:$0xff] }
 0x121   :  { %1110 = vmatprep.mubr.f32.mxu0 %v1288_v20  ;;  %1180 = vmatpush2.msra.mxu1 %v336_v19  ;;  %v541_v19 = vld [vmem:[#allocation5 + $0xf88] sm:$0xff]  ;;  %v688_v20 = vpop.f32.mrf.mxu0 }
 0x122   :  { %1181 = vmatprep.mubr.f32.mxu1 %v1398_v15  ;;  %1111 = vmatmul.mubr.f32.vlgmr.msra.gmra.mxu0 %v1289_v63  ;;  %v499_v15 = vld [vmem:[#allocation5 + $0xe38] sm:$0xff]  ;;  %v758_v63 = vadd.f32 %v757_v13, %v686_v12 }
 0x123   :  { %1182 = vmatmul.mubr.f32.vlgmr.msra.gmra.mxu1 %v1401_v17  ;;  %1188 = vmatprep.subr.mxu0 %v523_v21  ;;  %v492_v17 = vld [vmem:[#allocation5 + $0xe00] sm:$0xff]  ;;  %v759_v21 = vpop.f32.mrf.mxu1 }
 0x124   :  { %1252 = vmatprep.mubr.f32.mxu0 %v1290_v2  ;;  %1189 = vmatpush1.msra.mxu0 %v522_v22  ;;  %v540_v22 = vld [vmem:[#allocation5 + $0xf80] sm:$0xff] }
 0x125   :  { %1190 = vmatprep.subr.mxu0 %v517_v23  ;;  %v535_v23 = vld [vmem:[#allocation5 + $0xf58] sm:$0xff] }
 0x126   :  { %1191 = vmatpush1.msra.mxu0 %v516_v24  ;;  %v534_v24 = vld [vmem:[#allocation5 + $0xf50] sm:$0xff] }
 0x127   :  { %1192 = vmatprep.subr.mxu0 %v511_v25  ;;  %v760_v25 = vadd.f32 %v759_v21, %v688_v20 }
 0x128   :  { %1193 = vmatpush1.msra.mxu0 %v510_v26  ;;  %v529_v26 = vld [vmem:[#allocation5 + $0xf28] sm:$0xff] }
 0x129   :  { %1194 = vmatprep.subr.mxu0 %v505_v7 }
 0x12a   :  { %1195 = vmatpush1.msra.mxu0 %v504_v27  ;;  %v528_v27 = vld [vmem:[#allocation5 + $0xf20] sm:$0xff] }
 0x12b   :  { %1196 = vmatprep.subr.mxu0 %v499_v15 }
 0x12c   :  { %1197 = vmatpush1.msra.mxu0 %v498_v28 }
 0x12d   :  { %1198 = vmatprep.subr.mxu0 %v493_v9  ;;  %v1291_v9 = vld [vmem:[#allocation2 + $0x20] sm:$0xff] }
 0x12e   :  { %1199 = vmatpush1.msra.mxu0 %v492_v17 }
 0x12f   :  { %1200 = vmatprep.subr.mxu0 %v487_v29 }
 0x130   :  { %1201 = vmatpush1.msra.mxu0 %v486_v30 }
 0x131   :  { %1202 = vmatprep.subr.mxu0 %v481_v31 }
 0x132   :  { %1203 = vmatpush1.msra.mxu0 %v480_v32 }
 0x133   :  { %1204 = vmatprep.subr.mxu0 %v475_v33 }
 0x134   :  { %1205 = vmatpush1.msra.mxu0 %v474_v34 }
 0x135   :  { %1206 = vmatprep.subr.mxu0 %v469_v35 }
 0x136   :  { %1207 = vmatpush1.msra.mxu0 %v468_v36 }
 0x137   :  { %1208 = vmatprep.subr.mxu0 %v463_v37 }
 0x138   :  { %1209 = vmatpush1.msra.mxu0 %v462_v38 }
 0x139   :  { %1210 = vmatprep.subr.mxu0 %v457_v39 }
 0x13a   :  { %1211 = vmatpush1.msra.mxu0 %v456_v40 }
 0x13b   :  { %1212 = vmatprep.subr.mxu0 %v451_v41 }
 0x13c   :  { %1213 = vmatpush1.msra.mxu0 %v450_v42 }
 0x13d   :  { %1214 = vmatprep.subr.mxu0 %v445_v43 }
 0x13e   :  { %1215 = vmatpush1.msra.mxu0 %v444_v44 }
 0x13f   :  { %1216 = vmatprep.subr.mxu0 %v439_v45 }
 0x140   :  { %1217 = vmatpush1.msra.mxu0 %v438_v46 }
 0x141   :  { %1218 = vmatprep.subr.mxu0 %v433_v47 }
 0x142   :  { %1219 = vmatpush1.msra.mxu0 %v432_v48 }
 0x143   :  { %1220 = vmatprep.subr.mxu0 %v619_v49 }
 0x144   :  { %1221 = vmatpush2.msra.mxu0 %v618_v50 }
 0x145   :  { %1222 = vmatprep.subr.mxu0 %v613_v51 }
 0x146   :  { %1223 = vmatpush2.msra.mxu0 %v612_v52 }
 0x147   :  { %1224 = vmatprep.subr.mxu0 %v607_v53 }
 0x148   :  { %1225 = vmatpush2.msra.mxu0 %v606_v54 }
 0x149   :  { %1226 = vmatprep.subr.mxu0 %v601_v55 }
 0x14a   :  { %1227 = vmatpush2.msra.mxu0 %v600_v56 }
 0x14b   :  { %1228 = vmatprep.subr.mxu0 %v595_v57 }
 0x14c   :  { %1229 = vmatpush2.msra.mxu0 %v594_v58 }
 0x14d   :  { %1230 = vmatprep.subr.mxu0 %v589_v59 }
 0x14e   :  { %1231 = vmatpush2.msra.mxu0 %v588_v60 }
 0x14f   :  { %1232 = vmatprep.subr.mxu0 %v583_v61 }
 0x150   :  { %1233 = vmatpush2.msra.mxu0 %v582_v62 }
 0x151   :  { %1234 = vmatprep.subr.mxu0 %v577_v0 }
 0x152   :  { %1235 = vmatpush2.msra.mxu0 %v576_v1 }
 0x153   :  { %1236 = vmatprep.subr.mxu0 %v571_v3 }
 0x154   :  { %1237 = vmatpush2.msra.mxu0 %v570_v4 }
 0x155   :  { %1238 = vmatprep.subr.mxu0 %v565_v5 }
 0x156   :  { %1239 = vmatpush2.msra.mxu0 %v564_v6 }
 0x157   :  { %1240 = vmatprep.subr.mxu0 %v559_v8 }
 0x158   :  { %1241 = vmatpush2.msra.mxu0 %v558_v10 }
 0x159   :  { %1242 = vmatprep.subr.mxu0 %v553_v11 }
 0x15a   :  { %1243 = vmatpush2.msra.mxu0 %v552_v14 }
 0x15b   :  { %1244 = vmatprep.subr.mxu0 %v547_v16 }
 0x15c   :  { %1245 = vmatpush2.msra.mxu0 %v546_v18 }
 0x15d   :  { %1246 = vmatprep.subr.mxu0 %v541_v19 }
 0x15e   :  { %v828_v2 = vpop.f32.mrf.mxu0  ;;  %1247 = vmatpush2.msra.mxu0 %v540_v22 }
 0x15f   :  { %v829_v7 = vadd.f32 %v828_v2, %v758_v63  ;;  %1248 = vmatprep.subr.mxu0 %v535_v23 }
 0x160   :  { %v830_v15 = vpop.f32.mrf.mxu0  ;;  %1249 = vmatpush2.msra.mxu0 %v534_v24  ;;  %v899_v17 = vpop.f32.mrf.mxu1 }
 0x161   :  { %1259 = vst [vmem:[#allocation7] sm:$0xff] %v829_v7  ;;  %v831_v28 = vadd.f32 %v830_v15, %v760_v25  ;;  %1250 = vmatprep.subr.mxu0 %v529_v26 }
 0x162   :  { %1251 = vmatpush2.msra.mxu0 %v528_v27  ;;  %v901_v29 = vpop.f32.mrf.mxu1 }
 0x163   :  { %1260 = vst [vmem:[#allocation7 + $0x8] sm:$0xff] %v831_v28  ;;  %1253 = vmatmul.mubr.f32.vlgmr.msra.gmra.mxu0 %v1291_v9 }
 0x1a0   :  { %v970_v30 = vpop.f32.mrf.mxu0 }
 0x1a1   :  { %v971_v31 = vadd.f32 %v970_v30, %v899_v17 }
 0x1a2   :  { %v972_v32 = vpop.f32.mrf.mxu0  ;;  %v1041_v33 = vpop.f32.mrf.mxu1 }
 0x1a3   :  { %v973_v34 = vadd.f32 %v972_v32, %v901_v29  ;;  %v1042_v35 = vadd.f32 %v1041_v33, %v971_v31 }
 0x1a4   :  { %v1043_v36 = vpop.f32.mrf.mxu1 }
 0x1a5   :  { %1261 = vst [vmem:[#allocation7 + $0x10] sm:$0xff] %v1042_v35  ;;  %v1044_v37 = vadd.f32 %v1043_v36, %v973_v34 }
 0x1a7   :  { %1262 = vst [vmem:[#allocation7 + $0x18] sm:$0xff] %v1044_v37 }
 0x1e2   :  { %v1112_v38 = vpop.f32.mrf.mxu0 }
 0x1e3   :  { %v1183_v39 = vpop.f32.mrf.mxu1 }
 0x1e4   :  { %v1114_v40 = vpop.f32.mrf.mxu0  ;;  %v1184_v42 = vadd.f32 %v1183_v39, %v1112_v38 }
 0x1e5   :  { %v1185_v41 = vpop.f32.mrf.mxu1 }
 0x1e6   :  { %v1186_v44 = vadd.f32 %v1185_v41, %v1114_v40 }
 0x223   :  { %v1254_v43 = vpop.f32.mrf.mxu0 }
 0x224   :  { %v1255_v45 = vadd.f32 %v1254_v43, %v1184_v42 }
 0x225   :  { %v1256_v46 = vpop.f32.mrf.mxu0 }
 0x226   :  { %1263 = vst [vmem:[#allocation7 + $0x20] sm:$0xff] %v1255_v45  ;;  %v1257_v47 = vadd.f32 %v1256_v46, %v1186_v44 }
 0x228   :  { %1264 = vst [vmem:[#allocation7 + $0x28] sm:$0xff] %v1257_v47 }
 0x229   :  { %1343 = shalt.err (!%p1340_p0)
}
 0x22a   :  { %1274 = dma.vmem_to_hbm [thread:$0]  %s1272_s1, 768, %s1413_s2, [#allocation4]  }
 0x22b   :  { %1356 = dma.done.wait [#allocation4], 768  }
 0x22c   :  { %1357 = vsyncadd [#allocation4], 4294966528 }
 0x22d   :  { %1278 = vsyncpa [#allocation3], 1 }
 0x22e   :  { %1279 = vsyncpa [#allocation6], 1 }
 0x22f   :  { %1280 = vsyncpa [#allocation4], 1 }

</bundles_post_ra>
